<compile_context>
chip_gen: v6e
topology: v6e:2x2x1
jax: 0.10.0
libtpu: 0.0.40
codegen_flags: <defaults>
</compile_context>

<pallas_src>
import jax
import jax.numpy as jnp
from jax.experimental import pallas as pl
from jax.experimental.pallas import tpu as pltpu

EPS = 1e-12      # F.normalize default eps
LANE = 128
SUBLANE = 8


def _round_up(n, m):
    return (n + m - 1) // m * m


def _l2_normalize(x, eps=EPS):
    # F.normalize(x, p=2, dim=-1): x / clamp_min(||x||, eps), via rsqrt (EUP).
    sumsq = jnp.sum(x * x, axis=-1, keepdims=True)
    return x * jax.lax.rsqrt(jnp.maximum(sumsq, eps * eps))


# ---------------------------------------------------------------------------
# Host-side prep: pad + flatten only (no 9x im2col expansion).
# ---------------------------------------------------------------------------
def _prep_padded_flat(x_nchw):
    """NCHW f32 -> ([B, L, C] f32 zero-padded flat NHWC, M, L, Wp).

    The image is zero-padded by 1 on each spatial side (the conv padding) and
    flattened row-major, so for conv tap (dy, dx) the input row needed by flat
    output position q is simply row q + dy*Wp + dx of this array.
    """
    B, C, H, W = x_nchw.shape
    Wp = W + 2
    x_nhwc = jnp.transpose(x_nchw, (0, 2, 3, 1))
    xp = jnp.pad(x_nhwc, ((0, 0), (1, 1), (1, 1), (0, 0)))      # [B, H+2, Wp, C]
    M = _round_up(H * Wp, SUBLANE)        # conv-output rows (padded-x grid)
    L = M + 2 * Wp + 2                    # rows needed for the largest tap shift
    xflat = xp.reshape(B, (H + 2) * Wp, C)
    xflat = jnp.pad(xflat, ((0, 0), (0, L - (H + 2) * Wp), (0, 0)))
    return xflat, M, L, Wp


def _make_pool_weights(H, W, Wp, M):
    """[M, 1] f32: 1/(H*W) at valid conv-output positions, 0 at padded ones."""
    q = jnp.arange(M)
    valid = ((q % Wp) < W) & ((q // Wp) < H)
    return (valid.astype(jnp.float32) / float(H * W)).reshape(M, 1)


# ---------------------------------------------------------------------------
# Kernel 1: encoder stem (fused im2col conv + ReLU + masked global avg pool
#           + L2 normalize), one image per grid step.
# ---------------------------------------------------------------------------
def _make_encoder_kernel(Wp, M, Fp):
    def kernel(xflat_ref, cw_ref, cb_ref, poolw_ref, z_ref):
        # xflat_ref: [1, L, C]  f32   flattened zero-padded NHWC image
        # cw_ref:    [9, C, Fp] bf16  conv weight, tap-major / channel-inner
        # cb_ref:    [1, Fp]    f32
        # poolw_ref: [M, 1]     f32   (validity mask * 1/(H*W))
        # z_ref:     [1, 1, Fp] f32   L2-normalized pooled features
        acc = None
        for dy in range(3):
            for dx in range(3):
                start = dy * Wp + dx
                # shifted in-VMEM row slice == this tap's im2col column block
                lhs = xflat_ref[0, start:start + M, :].astype(jnp.bfloat16)
                tap = jnp.dot(lhs, cw_ref[dy * 3 + dx],
                              preferred_element_type=jnp.float32)   # [M, Fp]
                acc = tap if acc is None else acc + tap
        feat = jnp.maximum(acc + cb_ref[...], 0.0)                   # [M, Fp]
        # Masked global-average pool (padded columns weighted 0, mean scale
        # folded in). Two-stage reduce: VPU adds over M//8 groups, then one
        # 8->1 sublane reduce on the XLU.
        masked = feat * poolw_ref[...]
        part = jnp.sum(masked.reshape(M // SUBLANE, SUBLANE, Fp), axis=0)
        pooled = jnp.sum(part, axis=0, keepdims=True)                # [1, Fp]
        z_ref[...] = _l2_normalize(pooled)[None]                     # [1,1,Fp]
    return kernel


# ---------------------------------------------------------------------------
# Kernel 2: projection head, batched over ALL rows in one matmul pair.
# ---------------------------------------------------------------------------
def _projection_kernel(z_ref, w1_ref, b1_ref, w2_ref, b2_ref, out_ref):
    z = z_ref[...].astype(jnp.bfloat16)                              # [B, Fp]
    h = jnp.dot(z, w1_ref[...], preferred_element_type=jnp.float32) + b1_ref[...]
    h = jnp.maximum(h, 0.0)
    f = jnp.dot(h.astype(jnp.bfloat16), w2_ref[...],
                preferred_element_type=jnp.float32) + b2_ref[...]
    out_ref[...] = _l2_normalize(f)


# ---------------------------------------------------------------------------
# VMEM budget computed from actual tile-padded, double-buffered block sizes.
# ---------------------------------------------------------------------------
def _tile_padded_bytes(shape, dtype):
    shape = tuple(int(d) for d in shape)
    if len(shape) == 1:
        shape = (1,) + shape
    *lead, s, l = shape
    n = 1
    for d in lead:
        n *= d
    return n * _round_up(s, SUBLANE) * _round_up(l, LANE) * jnp.dtype(dtype).itemsize


def _vmem_budget(blocks, headroom=4 * 1024 * 1024):
    total = sum(2 * _tile_padded_bytes(s, d) for s, d in blocks)  # double-buffered
    return int(min(max(2 * total + headroom, 8 * 1024 * 1024), 64 * 1024 * 1024))


# ---------------------------------------------------------------------------
# Full forward pass.
# ---------------------------------------------------------------------------
def network_forward(x_nchw, params, projection_size):
    B, C, H, W = x_nchw.shape

    xflat, M, L, Wp = _prep_padded_flat(x_nchw)
    poolw = _make_pool_weights(H, W, Wp, M)

    cw, cb = params['cw'], params['cb']
    w1, b1 = params['w1'], params['b1']
    w2, b2 = params['w2'], params['b2']
    Fp, Lp, Pp = cw.shape[-1], w1.shape[-1], w2.shape[-1]

    # ----------------- Encoder: fused conv stem + pooled features ----------
    enc_blocks = [((1, L, C), xflat.dtype), ((9, C, Fp), cw.dtype),
                  ((1, Fp), cb.dtype), ((M, 1), poolw.dtype),
                  ((1, 1, Fp), jnp.float32)]
    enc_flops = 2 * B * M * 9 * C * Fp
    enc_bytes = (B * L * C * 4 + 9 * C * Fp * 2 + Fp * 4 + M * 4 + B * Fp * 4)

    z = pl.pallas_call(
        _make_encoder_kernel(Wp, M, Fp),
        out_shape=jax.ShapeDtypeStruct((B, 1, Fp), jnp.float32),
        grid_spec=pltpu.PrefetchScalarGridSpec(
            num_scalar_prefetch=0,
            grid=(B,),
            in_specs=[
                # one padded image per step: pipelined / double-buffered DMA
                pl.BlockSpec((1, L, C), lambda b: (b, 0, 0)),
                # weights / bias / pool mask: whole-array revisited blocks
                pl.BlockSpec((9, C, Fp), lambda b: (0, 0, 0)),
                pl.BlockSpec((1, Fp), lambda b: (0, 0)),
                pl.BlockSpec((M, 1), lambda b: (0, 0)),
            ],
            out_specs=pl.BlockSpec((1, 1, Fp), lambda b: (b, 0, 0)),
        ),
        compiler_params=pltpu.CompilerParams(
            # batch axis parallel: v7x megacore can split it across both TCs
            dimension_semantics=("parallel",),
            vmem_limit_bytes=_vmem_budget(enc_blocks)),
        cost_estimate=pl.CostEstimate(
            flops=int(enc_flops),
            transcendentals=int(B),               # ~1 rsqrt per batch row
            bytes_accessed=int(enc_bytes)),
    )(xflat, cw, cb, poolw)

    z = z.reshape(B, Fp)

    # ----------- Projection head: one batched matmul pair for all B --------
    proj_blocks = [((B, Fp), jnp.float32), ((Fp, Lp), w1.dtype),
                   ((1, Lp), b1.dtype), ((Lp, Pp), w2.dtype),
                   ((1, Pp), b2.dtype), ((B, Pp), jnp.float32)]
    proj_flops = 2 * B * (Fp * Lp + Lp * Pp)
    proj_bytes = (B * Fp * 4 + (Fp * Lp + Lp * Pp) * 2 + (Lp + Pp) * 4
                  + B * Pp * 4)

    out = pl.pallas_call(
        _projection_kernel,
        out_shape=jax.ShapeDtypeStruct((B, Pp), jnp.float32),
        grid_spec=pltpu.PrefetchScalarGridSpec(
            num_scalar_prefetch=0,
            grid=(1,),
            in_specs=[
                pl.BlockSpec((B, Fp), lambda i: (0, 0)),
                pl.BlockSpec((Fp, Lp), lambda i: (0, 0)),
                pl.BlockSpec((1, Lp), lambda i: (0, 0)),
                pl.BlockSpec((Lp, Pp), lambda i: (0, 0)),
                pl.BlockSpec((1, Pp), lambda i: (0, 0)),
            ],
            out_specs=pl.BlockSpec((B, Pp), lambda i: (0, 0)),
        ),
        compiler_params=pltpu.CompilerParams(
            dimension_semantics=("arbitrary",),
            vmem_limit_bytes=_vmem_budget(proj_blocks)),
        cost_estimate=pl.CostEstimate(
            flops=int(proj_flops),
            transcendentals=int(B),
            bytes_accessed=int(proj_bytes)),
    )(z, w1, b1, w2, b2)

    return out[:, :projection_size]


# ---------------------------------------------------------------------------
# Reference (plain JAX, host-side im2col -- only used for verification).
# ---------------------------------------------------------------------------
def _im2col_patches(x_nchw):
    B, C, H, W = x_nchw.shape
    x_nhwc = jnp.transpose(x_nchw, (0, 2, 3, 1))
    xp = jnp.pad(x_nhwc, ((0, 0), (1, 1), (1, 1), (0, 0)))
    cols = [xp[:, dy:dy + H, dx:dx + W, :] for dy in range(3) for dx in range(3)]
    p = jnp.stack(cols, axis=3)                       # [B, H, W, 9, C]
    return p.reshape(B, H * W, 9 * C).astype(jnp.bfloat16)


def reference_forward(x_nchw, params, projection_size):
    """Plain-JAX reference (same bf16 MXU operands / f32 accumulation)."""
    B, C, H, W = x_nchw.shape
    patches = _im2col_patches(x_nchw)                              # [B, HW, 9C]
    cw_flat = params['cw'].reshape(9 * C, -1)                      # [9C, Fp]
    feat = jnp.einsum('bpk,kf->bpf', patches, cw_flat,
                      preferred_element_type=jnp.float32)
    feat = jnp.maximum(feat + params['cb'], 0.0)
    z = _l2_normalize(jnp.mean(feat, axis=1))
    h = jnp.maximum(
        jnp.dot(z.astype(jnp.bfloat16), params['w1'],
                preferred_element_type=jnp.float32) + params['b1'], 0.0)
    f = jnp.dot(h.astype(jnp.bfloat16), params['w2'],
                preferred_element_type=jnp.float32) + params['b2']
    return _l2_normalize(f)[:, :projection_size]


# ---------------------------------------------------------------------------
# Parameter construction (matmul-ready layout, 128-lane zero padding).
# ---------------------------------------------------------------------------
def make_params(key, c_in, feature_size, linear_size, projection_size):
    """Weights packed matmul-ready; F/L/P zero-padded to 128 lanes.

    Invariant: padded rows/columns are exactly zero so both L2 normalizations
    are unaffected by the padding -- do not initialize padded lanes.
    """
    ks = jax.random.split(key, 6)
    Fp = _round_up(feature_size, LANE)
    Lp = _round_up(linear_size, LANE)
    Pp = _round_up(projection_size, LANE)

    # Conv weight in PyTorch layout [F, C, 3, 3], packed tap-major /
    # channel-inner to [9, C, Fp], matching the kernel's shifted-slice order.
    w_conv = jax.random.normal(ks[0], (feature_size, c_in, 3, 3), jnp.float32) * 0.1
    cw = jnp.transpose(w_conv, (2, 3, 1, 0)).reshape(9, c_in, feature_size)
    cw = jnp.zeros((9, c_in, Fp), jnp.float32).at[..., :feature_size].set(cw)

    cb = jnp.zeros((1, Fp), jnp.float32).at[:, :feature_size].set(
        jax.random.normal(ks[1], (1, feature_size), jnp.float32) * 0.01)
    w1 = jnp.zeros((Fp, Lp), jnp.float32).at[:feature_size, :linear_size].set(
        jax.random.normal(ks[2], (feature_size, linear_size), jnp.float32) * 0.1)
    b1 = jnp.zeros((1, Lp), jnp.float32).at[:, :linear_size].set(
        jax.random.normal(ks[3], (1, linear_size), jnp.float32) * 0.01)
    w2 = jnp.zeros((Lp, Pp), jnp.float32).at[:linear_size, :projection_size].set(
        jax.random.normal(ks[4], (linear_size, projection_size), jnp.float32) * 0.1)
    b2 = jnp.zeros((1, Pp), jnp.float32).at[:, :projection_size].set(
        jax.random.normal(ks[5], (1, projection_size), jnp.float32) * 0.01)

    # MXU operands in bf16 (f32 accumulation in the kernels); biases stay f32.
    return dict(cw=cw.astype(jnp.bfloat16), cb=cb,
                w1=w1.astype(jnp.bfloat16), b1=b1,
                w2=w2.astype(jnp.bfloat16), b2=b2)


if __name__ == "__main__":
    # Small shapes consistent with the module's forward:
    #   batch=2, in-channels=4, spatial=16x16,
    #   feature_size=32 (stand-in for the ResNet feature width),
    #   linear_size=64, projection_size=16.
    B, C, H, W = 2, 4, 16, 16
    feature_size, linear_size, projection_size = 32, 64, 16

    key = jax.random.PRNGKey(0)
    kx, kp = jax.random.split(key)
    x = jax.random.normal(kx, (B, C, H, W), jnp.float32)
    params = make_params(kp, C, feature_size, linear_size, projection_size)

    out = network_forward(x, params, projection_size)
    out = jax.block_until_ready(out)

    ref = reference_forward(x, params, projection_size)
    assert out.shape == (B, projection_size)
    assert jnp.allclose(out, ref, atol=2e-4, rtol=2e-4), "mismatch vs reference"

    print("KERNEL_OK")
</pallas_src>

<mosaic_0001>
module attributes {stable_mosaic.version = 11 : i64} {
  func.func @kernel(%arg0: i32, %arg1: memref<1x326x4xf32, #tpu.memory_space<vmem>>, %arg2: memref<9x4x128xbf16, #tpu.memory_space<vmem>>, %arg3: memref<1x128xf32, #tpu.memory_space<vmem>>, %arg4: memref<288x1xf32, #tpu.memory_space<vmem>>, %arg5: memref<1x1x128xf32, #tpu.memory_space<vmem>>) attributes {dimension_semantics = [#tpu.dimension_semantics<parallel>], iteration_bounds = array<i64: 2>, scalar_prefetch = 0 : i64, scratch_operands = 0 : i64, tpu.core_type = #tpu.core_type<tc>, window_params = [{transform_indices = @transform_0, window_bounds = array<i64: 1, 326, 4>}, {pipeline_mode = #tpu.pipeline_mode<synchronous>, transform_indices = @transform_1, window_bounds = array<i64: 9, 4, 128>}, {pipeline_mode = #tpu.pipeline_mode<synchronous>, transform_indices = @transform_2, window_bounds = array<i64: 1, 128>}, {pipeline_mode = #tpu.pipeline_mode<synchronous>, transform_indices = @transform_3, window_bounds = array<i64: 288, 1>}, {transform_indices = @transform_4, window_bounds = array<i64: 1, 1, 128>}]} {
    %c0 = arith.constant 0 : index
    %c0_0 = arith.constant 0 : index
    %c0_1 = arith.constant 0 : index
    %0 = vector.load %arg1[%c0, %c0_0, %c0_1] : memref<1x326x4xf32, #tpu.memory_space<vmem>>, vector<1x288x4xf32>
    %1 = vector.shape_cast %0 : vector<1x288x4xf32> to vector<288x4xf32>
    %2 = arith.truncf %1 : vector<288x4xf32> to vector<288x4xbf16>
    %c0_2 = arith.constant 0 : index
    %c0_3 = arith.constant 0 : index
    %c0_4 = arith.constant 0 : index
    %3 = vector.load %arg2[%c0_2, %c0_3, %c0_4] : memref<9x4x128xbf16, #tpu.memory_space<vmem>>, vector<1x4x128xbf16>
    %4 = vector.shape_cast %3 : vector<1x4x128xbf16> to vector<4x128xbf16>
    %cst = arith.constant dense<0.000000e+00> : vector<288x128xf32>
    %5 = tpu.matmul %2, %4, %cst {dimension_numbers = #tpu.dot_dimension_numbers<[1], [0], [0], [1], [0, 0, 1, 1], [], []>} : vector<288x4xbf16>, vector<4x128xbf16>, vector<288x128xf32> -> vector<288x128xf32>
    %c0_5 = arith.constant 0 : index
    %c1 = arith.constant 1 : index
    %c0_6 = arith.constant 0 : index
    %6 = vector.load %arg1[%c0_5, %c1, %c0_6] : memref<1x326x4xf32, #tpu.memory_space<vmem>>, vector<1x288x4xf32>
    %7 = vector.shape_cast %6 : vector<1x288x4xf32> to vector<288x4xf32>
    %8 = arith.truncf %7 : vector<288x4xf32> to vector<288x4xbf16>
    %c1_7 = arith.constant 1 : index
    %c0_8 = arith.constant 0 : index
    %c0_9 = arith.constant 0 : index
    %9 = vector.load %arg2[%c1_7, %c0_8, %c0_9] : memref<9x4x128xbf16, #tpu.memory_space<vmem>>, vector<1x4x128xbf16>
    %10 = vector.shape_cast %9 : vector<1x4x128xbf16> to vector<4x128xbf16>
    %cst_10 = arith.constant dense<0.000000e+00> : vector<288x128xf32>
    %11 = tpu.matmul %8, %10, %cst_10 {dimension_numbers = #tpu.dot_dimension_numbers<[1], [0], [0], [1], [0, 0, 1, 1], [], []>} : vector<288x4xbf16>, vector<4x128xbf16>, vector<288x128xf32> -> vector<288x128xf32>
    %12 = arith.addf %5, %11 : vector<288x128xf32>
    %c0_11 = arith.constant 0 : index
    %c2 = arith.constant 2 : index
    %c0_12 = arith.constant 0 : index
    %13 = vector.load %arg1[%c0_11, %c2, %c0_12] : memref<1x326x4xf32, #tpu.memory_space<vmem>>, vector<1x288x4xf32>
    %14 = vector.shape_cast %13 : vector<1x288x4xf32> to vector<288x4xf32>
    %15 = arith.truncf %14 : vector<288x4xf32> to vector<288x4xbf16>
    %c2_13 = arith.constant 2 : index
    %c0_14 = arith.constant 0 : index
    %c0_15 = arith.constant 0 : index
    %16 = vector.load %arg2[%c2_13, %c0_14, %c0_15] : memref<9x4x128xbf16, #tpu.memory_space<vmem>>, vector<1x4x128xbf16>
    %17 = vector.shape_cast %16 : vector<1x4x128xbf16> to vector<4x128xbf16>
    %cst_16 = arith.constant dense<0.000000e+00> : vector<288x128xf32>
    %18 = tpu.matmul %15, %17, %cst_16 {dimension_numbers = #tpu.dot_dimension_numbers<[1], [0], [0], [1], [0, 0, 1, 1], [], []>} : vector<288x4xbf16>, vector<4x128xbf16>, vector<288x128xf32> -> vector<288x128xf32>
    %19 = arith.addf %12, %18 : vector<288x128xf32>
    %c0_17 = arith.constant 0 : index
    %c18 = arith.constant 18 : index
    %c0_18 = arith.constant 0 : index
    %20 = vector.load %arg1[%c0_17, %c18, %c0_18] : memref<1x326x4xf32, #tpu.memory_space<vmem>>, vector<1x288x4xf32>
    %21 = vector.shape_cast %20 : vector<1x288x4xf32> to vector<288x4xf32>
    %22 = arith.truncf %21 : vector<288x4xf32> to vector<288x4xbf16>
    %c3 = arith.constant 3 : index
    %c0_19 = arith.constant 0 : index
    %c0_20 = arith.constant 0 : index
    %23 = vector.load %arg2[%c3, %c0_19, %c0_20] : memref<9x4x128xbf16, #tpu.memory_space<vmem>>, vector<1x4x128xbf16>
    %24 = vector.shape_cast %23 : vector<1x4x128xbf16> to vector<4x128xbf16>
    %cst_21 = arith.constant dense<0.000000e+00> : vector<288x128xf32>
    %25 = tpu.matmul %22, %24, %cst_21 {dimension_numbers = #tpu.dot_dimension_numbers<[1], [0], [0], [1], [0, 0, 1, 1], [], []>} : vector<288x4xbf16>, vector<4x128xbf16>, vector<288x128xf32> -> vector<288x128xf32>
    %26 = arith.addf %19, %25 : vector<288x128xf32>
    %c0_22 = arith.constant 0 : index
    %c19 = arith.constant 19 : index
    %c0_23 = arith.constant 0 : index
    %27 = vector.load %arg1[%c0_22, %c19, %c0_23] : memref<1x326x4xf32, #tpu.memory_space<vmem>>, vector<1x288x4xf32>
    %28 = vector.shape_cast %27 : vector<1x288x4xf32> to vector<288x4xf32>
    %29 = arith.truncf %28 : vector<288x4xf32> to vector<288x4xbf16>
    %c4 = arith.constant 4 : index
    %c0_24 = arith.constant 0 : index
    %c0_25 = arith.constant 0 : index
    %30 = vector.load %arg2[%c4, %c0_24, %c0_25] : memref<9x4x128xbf16, #tpu.memory_space<vmem>>, vector<1x4x128xbf16>
    %31 = vector.shape_cast %30 : vector<1x4x128xbf16> to vector<4x128xbf16>
    %cst_26 = arith.constant dense<0.000000e+00> : vector<288x128xf32>
    %32 = tpu.matmul %29, %31, %cst_26 {dimension_numbers = #tpu.dot_dimension_numbers<[1], [0], [0], [1], [0, 0, 1, 1], [], []>} : vector<288x4xbf16>, vector<4x128xbf16>, vector<288x128xf32> -> vector<288x128xf32>
    %33 = arith.addf %26, %32 : vector<288x128xf32>
    %c0_27 = arith.constant 0 : index
    %c20 = arith.constant 20 : index
    %c0_28 = arith.constant 0 : index
    %34 = vector.load %arg1[%c0_27, %c20, %c0_28] : memref<1x326x4xf32, #tpu.memory_space<vmem>>, vector<1x288x4xf32>
    %35 = vector.shape_cast %34 : vector<1x288x4xf32> to vector<288x4xf32>
    %36 = arith.truncf %35 : vector<288x4xf32> to vector<288x4xbf16>
    %c5 = arith.constant 5 : index
    %c0_29 = arith.constant 0 : index
    %c0_30 = arith.constant 0 : index
    %37 = vector.load %arg2[%c5, %c0_29, %c0_30] : memref<9x4x128xbf16, #tpu.memory_space<vmem>>, vector<1x4x128xbf16>
    %38 = vector.shape_cast %37 : vector<1x4x128xbf16> to vector<4x128xbf16>
    %cst_31 = arith.constant dense<0.000000e+00> : vector<288x128xf32>
    %39 = tpu.matmul %36, %38, %cst_31 {dimension_numbers = #tpu.dot_dimension_numbers<[1], [0], [0], [1], [0, 0, 1, 1], [], []>} : vector<288x4xbf16>, vector<4x128xbf16>, vector<288x128xf32> -> vector<288x128xf32>
    %40 = arith.addf %33, %39 : vector<288x128xf32>
    %c0_32 = arith.constant 0 : index
    %c36 = arith.constant 36 : index
    %c0_33 = arith.constant 0 : index
    %41 = vector.load %arg1[%c0_32, %c36, %c0_33] : memref<1x326x4xf32, #tpu.memory_space<vmem>>, vector<1x288x4xf32>
    %42 = vector.shape_cast %41 : vector<1x288x4xf32> to vector<288x4xf32>
    %43 = arith.truncf %42 : vector<288x4xf32> to vector<288x4xbf16>
    %c6 = arith.constant 6 : index
    %c0_34 = arith.constant 0 : index
    %c0_35 = arith.constant 0 : index
    %44 = vector.load %arg2[%c6, %c0_34, %c0_35] : memref<9x4x128xbf16, #tpu.memory_space<vmem>>, vector<1x4x128xbf16>
    %45 = vector.shape_cast %44 : vector<1x4x128xbf16> to vector<4x128xbf16>
    %cst_36 = arith.constant dense<0.000000e+00> : vector<288x128xf32>
    %46 = tpu.matmul %43, %45, %cst_36 {dimension_numbers = #tpu.dot_dimension_numbers<[1], [0], [0], [1], [0, 0, 1, 1], [], []>} : vector<288x4xbf16>, vector<4x128xbf16>, vector<288x128xf32> -> vector<288x128xf32>
    %47 = arith.addf %40, %46 : vector<288x128xf32>
    %c0_37 = arith.constant 0 : index
    %c37 = arith.constant 37 : index
    %c0_38 = arith.constant 0 : index
    %48 = vector.load %arg1[%c0_37, %c37, %c0_38] : memref<1x326x4xf32, #tpu.memory_space<vmem>>, vector<1x288x4xf32>
    %49 = vector.shape_cast %48 : vector<1x288x4xf32> to vector<288x4xf32>
    %50 = arith.truncf %49 : vector<288x4xf32> to vector<288x4xbf16>
    %c7 = arith.constant 7 : index
    %c0_39 = arith.constant 0 : index
    %c0_40 = arith.constant 0 : index
    %51 = vector.load %arg2[%c7, %c0_39, %c0_40] : memref<9x4x128xbf16, #tpu.memory_space<vmem>>, vector<1x4x128xbf16>
    %52 = vector.shape_cast %51 : vector<1x4x128xbf16> to vector<4x128xbf16>
    %cst_41 = arith.constant dense<0.000000e+00> : vector<288x128xf32>
    %53 = tpu.matmul %50, %52, %cst_41 {dimension_numbers = #tpu.dot_dimension_numbers<[1], [0], [0], [1], [0, 0, 1, 1], [], []>} : vector<288x4xbf16>, vector<4x128xbf16>, vector<288x128xf32> -> vector<288x128xf32>
    %54 = arith.addf %47, %53 : vector<288x128xf32>
    %c0_42 = arith.constant 0 : index
    %c38 = arith.constant 38 : index
    %c0_43 = arith.constant 0 : index
    %55 = vector.load %arg1[%c0_42, %c38, %c0_43] : memref<1x326x4xf32, #tpu.memory_space<vmem>>, vector<1x288x4xf32>
    %56 = vector.shape_cast %55 : vector<1x288x4xf32> to vector<288x4xf32>
    %57 = arith.truncf %56 : vector<288x4xf32> to vector<288x4xbf16>
    %c8 = arith.constant 8 : index
    %c0_44 = arith.constant 0 : index
    %c0_45 = arith.constant 0 : index
    %58 = vector.load %arg2[%c8, %c0_44, %c0_45] : memref<9x4x128xbf16, #tpu.memory_space<vmem>>, vector<1x4x128xbf16>
    %59 = vector.shape_cast %58 : vector<1x4x128xbf16> to vector<4x128xbf16>
    %cst_46 = arith.constant dense<0.000000e+00> : vector<288x128xf32>
    %60 = tpu.matmul %57, %59, %cst_46 {dimension_numbers = #tpu.dot_dimension_numbers<[1], [0], [0], [1], [0, 0, 1, 1], [], []>} : vector<288x4xbf16>, vector<4x128xbf16>, vector<288x128xf32> -> vector<288x128xf32>
    %61 = arith.addf %54, %60 : vector<288x128xf32>
    %c0_47 = arith.constant 0 : index
    %c0_48 = arith.constant 0 : index
    %62 = vector.load %arg3[%c0_47, %c0_48] : memref<1x128xf32, #tpu.memory_space<vmem>>, vector<1x128xf32>
    %63 = vector.broadcast %62 : vector<1x128xf32> to vector<288x128xf32>
    %64 = arith.addf %61, %63 : vector<288x128xf32>
    %cst_49 = arith.constant 0.000000e+00 : f32
    %65 = vector.broadcast %cst_49 : f32 to vector<288x128xf32>
    %66 = arith.maximumf %64, %65 : vector<288x128xf32>
    %c0_50 = arith.constant 0 : index
    %c0_51 = arith.constant 0 : index
    %67 = vector.load %arg4[%c0_50, %c0_51] : memref<288x1xf32, #tpu.memory_space<vmem>>, vector<288x1xf32>
    %68 = vector.broadcast %67 : vector<288x1xf32> to vector<288x128xf32>
    %69 = arith.mulf %66, %68 : vector<288x128xf32>
    %70 = vector.shape_cast %69 : vector<288x128xf32> to vector<36x8x128xf32>
    %cst_52 = arith.constant dense<0.000000e+00> : vector<8x128xf32>
    %71 = vector.multi_reduction <add>, %70, %cst_52 [0] : vector<36x8x128xf32> to vector<8x128xf32>
    %cst_53 = arith.constant dense<0.000000e+00> : vector<128xf32>
    %72 = vector.multi_reduction <add>, %71, %cst_53 [0] : vector<8x128xf32> to vector<128xf32>
    %73 = vector.shape_cast %72 : vector<128xf32> to vector<1x128xf32>
    %74 = arith.mulf %73, %73 : vector<1x128xf32>
    %cst_54 = arith.constant dense<0.000000e+00> : vector<1xf32>
    %75 = vector.multi_reduction <add>, %74, %cst_54 [1] : vector<1x128xf32> to vector<1xf32>
    %76 = vector.shape_cast %75 : vector<1xf32> to vector<1x1xf32>
    %cst_55 = arith.constant 1.000000e-24 : f32
    %77 = vector.broadcast %cst_55 : f32 to vector<1x1xf32>
    %78 = arith.maximumf %76, %77 : vector<1x1xf32>
    %79 = math.rsqrt %78 : vector<1x1xf32>
    %80 = vector.broadcast %79 : vector<1x1xf32> to vector<1x128xf32>
    %81 = arith.mulf %73, %80 : vector<1x128xf32>
    %82 = vector.shape_cast %81 : vector<1x128xf32> to vector<1x1x128xf32>
    %c0_56 = arith.constant 0 : index
    %c0_57 = arith.constant 0 : index
    %c0_58 = arith.constant 0 : index
    %83 = vector.load %arg5[%c0_56, %c0_57, %c0_58] : memref<1x1x128xf32, #tpu.memory_space<vmem>>, vector<1x1x128xf32>
    tpu.vector_store %arg5[%c0_56, %c0_57, %c0_58], %82 {strides = array<i32>} : memref<1x1x128xf32, #tpu.memory_space<vmem>>, vector<1x1x128xf32>,
    return
  }
  func.func @transform_0(%arg0: i32) -> (i32, i32, i32) {
    %c0_i32 = arith.constant 0 : i32
    %c0_i32_0 = arith.constant 0 : i32
    %c0_i32_1 = arith.constant 0 : i32
    return %arg0, %c0_i32, %c0_i32_0 : i32, i32, i32
  }
  func.func @transform_1(%arg0: i32) -> (i32, i32, i32) {
    %c0_i32 = arith.constant 0 : i32
    %c0_i32_0 = arith.constant 0 : i32
    %c0_i32_1 = arith.constant 0 : i32
    %c0_i32_2 = arith.constant 0 : i32
    return %c0_i32, %c0_i32_0, %c0_i32_1 : i32, i32, i32
  }
  func.func @transform_2(%arg0: i32) -> (i32, i32) {
    %c0_i32 = arith.constant 0 : i32
    %c0_i32_0 = arith.constant 0 : i32
    %c0_i32_1 = arith.constant 0 : i32
    return %c0_i32, %c0_i32_0 : i32, i32
  }
  func.func @transform_3(%arg0: i32) -> (i32, i32) {
    %c0_i32 = arith.constant 0 : i32
    %c0_i32_0 = arith.constant 0 : i32
    %c0_i32_1 = arith.constant 0 : i32
    return %c0_i32, %c0_i32_0 : i32, i32
  }
  func.func @transform_4(%arg0: i32) -> (i32, i32, i32) {
    %c0_i32 = arith.constant 0 : i32
    %c0_i32_0 = arith.constant 0 : i32
    %c0_i32_1 = arith.constant 0 : i32
    return %arg0, %c0_i32, %c0_i32_0 : i32, i32, i32
  }
}

</mosaic_0001>

<bundles_post_ra>
// kernel: tpu_custom_call.1
= control target key start
LH: loop header
LB: loop body
LE: loop exit
PB: predicated region body
PF: predicated region fallthrough
CT: control target
= control target key end

     0   :  { %9 = vsyncpa [#allocation3], 0  ;;  %s5633_s0 = inlined_call_operand.vmem [shape: f32[2,326,4], index: 0, kind: input, shape index: {}]   ;;  %s5634_s1 = inlined_call_operand.vmem [shape: bf16[9,4,128], index: 1, kind: input, shape index: {}]   ;;  %s5635_s2 = inlined_call_operand.vmem [shape: f32[1,128], index: 2, kind: input, shape index: {}]   ;;  %s5636_s3 = inlined_call_operand.vmem [shape: f32[288,1], index: 3, kind: input, shape index: {}]   ;;  %s5637_s4 = inlined_call_operand.hbm [shape: f32[2,1,128], index: 4, kind: output, shape index: {}]  }
   0x1   :  { %11 = vsyncpa [#allocation3 + $0x1], 0  ;;  %s4344_s15 = smov 0   ;;  %s4346_s16 = smov 0  }
   0x2   :  { %s4348_s17 = smov 0   ;;  %s4350_s18 = smov 0  }
   0x3 LB: > { %s4365_s19 = sadd.s32 4294967295, %s4315_s18   ;;  %s3506_s20 = sadd.s32 4294967294, %s4315_s18   ;;  %s4315_s18 = sphi %s4350_s18, %s5653_s18   ;;  %s4311_s17 = sphi %s4348_s17, %s5652_s17   ;;  %s4307_s16 = sphi %s4346_s16, %s5651_s16   ;;  %s4303_s15 = sphi %s4344_s15, %s5650_s15  }
   0x4   : > { %s4369_s21 = sadd.s32 1, %s4315_s18   ;;  %s113_s22 = sadd.s32 1, %s4311_s17 }
   0x5   : > { %s110_s23 = ssub.s32 %s4315_s18, %s4369_s21  ;;  %p123_p0 = scmp.ne.s32.totalorder %s4311_s17, %s4307_s16 }
   0x6   : > { %p111_p1 = scmp.eq.s32.totalorder %s110_s23, 0  ;;  %p124_p2 = scmp.eq.s32.totalorder %s4365_s19, 1 }
   0x7   : > { %p129_p3 = scmp.ne.s32.totalorder %s4307_s16, %s4303_s15  ;;  %p130_p4 = scmp.eq.s32.totalorder %s3506_s20, 1 }
   0x8   : > { %s4380_s24 = scalar_select %p111_p1, %s4311_s17, %s113_s22  }
   0x9   : > { %p4382_p5 = por %p124_p2, %p123_p0  ;;  %p4386_p6 = por %p130_p4, %p129_p3 }
   0xa   : > { %p3509_p7 = scmp.ge.s32.totalorder %s4315_s18, 1  ;;  %p165_p8 = scmp.lt.s32.totalorder %s4315_s18, 3 }
   0xc   : > { %p166_p9 = pnand %p3509_p7, %p165_p8 }
   0xe   : > { %169 = sbr.rel (%p166_p9) target bundleno = 746 (0x2ea), region = 36 }
  0x13   : > { %v3511_v0 = vld [vmem:[%s5634_s1 + $0x2] sm:$0x3]  ;;  %vm362_vm0 = vcmask 1041408   ;;  %p190_p10 = scmp.lt.s32.totalorder %s4365_s19, 1  ;;  %v3548_v2 = vld [vmem:[%s5634_s1 + $0x4] sm:$0x3] }
  0x14   : > { %4200 = vmatprep.subr.msk.bf16.mxu0 %vm362_vm0, %v3511_v0  ;;  %4201 = vmatprep.subr.msk.bf16.mxu1 %vm362_vm0, %v3511_v0  ;;  %v364_v1 = vsel %vm362_vm0, %v3511_v0, 0  ;;  %v250_v3 = vld [vmem:[%s5634_s1] sm:$0x3]  ;;  %vm307_vm1 = vcmask 31744   ;;  %v888_v15 = vsel %vm362_vm0, %v3548_v2, 0  ;;  %s188_s23 = sand.u32 1, %s4307_s16  }
  0x15   : > { %3857 = vmatpush3.bf16.msra.mxu0 %v364_v1  ;;  %4199 = vmatpush3.bf16.msra.mxu1 %v364_v1  ;;  %s191_s7 = scalar_select %p190_p10, %s4365_s19, 1  ;;  %v598_v18 = vsel %vm362_vm0, %v250_v3, 0  ;;  %v4433_v24 = vld [vmem:[%s5634_s1 + $0x6] sm:$0x3]  ;;  %v4438_v25 = vld [vmem:[%s5634_s1 + $0x8] sm:$0x3] }
  0x16   : > { %4203 = vmatprep.subr.msk.bf16.mxu0 %vm362_vm0, %v3548_v2  ;;  %4202 = vmatprep.subr.msk.bf16.mxu1 %vm362_vm0, %v250_v3  ;;  %s3682_s27 = sshll.u32 %s4365_s19, 4  ;;  %s189_s28 = scalar_lea.vmem [#allocation2], %s188_s23 }
  0x17   : > { %s4210_s8 = smul.u32 328, %s191_s7  ;;  %s3451_s29 = sshll.u32 %s189_s28, 4  ;;  %s3452_s29 = int_to_ptr.vmem [resolvable:$true] %s3451_s29 }
  0x18   : > { %s3449_s6 = scalar_lea.hbm %s5637_s4, %s3682_s27  ;;  %s3439_s7 = scalar_lea.sflag [#allocation3], %s188_s23 }
  0x19   : > { %s4411_s11 = scalar_lea.vmem %s5633_s0, %s4210_s8  ;;  %s4255_s8 = scalar_lea.vmem %s3452_s29, 16 }
  0x1a   : > { %v251_v4 = vld [vmem:[%s4411_s11 + $0x1] sm:$0xff]  ;;  %v252_v5 = vld [vmem:[%s4411_s11 + $0x9] sm:$0xff]  ;;  %v253_v9 = vld [vmem:[%s4411_s11 + $0x11] sm:$0xff]  ;;  %p4256_p11 = scmp.ne.s32.totalorder %s3452_s29, %s4255_s8  ;;  %s4318_s9 = smov [#allocation2]  }
  0x1b   : > { %v271_v6 = vld [vmem:[%s4411_s11 + $0xa1] sm:$0xff]  ;;  %v287_v7 = vpack.c.bf16 %v252_v5, %v251_v4  ;;  %v272_v8 = vld [vmem:[%s4411_s11 + $0xa9] sm:$0xff]  ;;  %v254_v10 = vld [vmem:[%s4411_s11 + $0x19] sm:$0xff]  ;;  %s4259_s10 = sshll.u32 %s4318_s9, 4  ;;  %s4260_s10 = int_to_ptr.vmem [resolvable:$false] %s4259_s10 }
  0x1c   : > { %v297_v11 = vpack.c.bf16 %v272_v8, %v271_v6  ;;  %v288_v12 = vpack.c.bf16 %v254_v10, %v253_v9  ;;  %v273_v13 = vld [vmem:[%s4411_s11 + $0xb1] sm:$0xff]  ;;  %v274_v14 = vld [vmem:[%s4411_s11 + $0xb9] sm:$0xff]  ;;  %v255_v16 = vld [vmem:[%s4411_s11 + $0x21] sm:$0xff]  ;;  %v1214_v10 = vsel %vm362_vm0, %v4433_v24, 0  ;;  %p4257_p12 = pnand %p4256_p11, %p4382_p5  ;;  %s4261_s19 = scalar_lea.vmem %s4260_s10, 32 }
  0x1d   : > { %3858 = vmatprep.mubr.msk.bf16.mxu0 %vm307_vm1, %v287_v7  ;;  %v298_v17 = vpack.c.bf16 %v274_v14, %v273_v13  ;;  %v256_v19 = vld [vmem:[%s4411_s11 + $0x29] sm:$0xff]  ;;  %v275_v20 = vld [vmem:[%s4411_s11 + $0xc1] sm:$0xff]  ;;  %v257_v26 = vld [vmem:[%s4411_s11 + $0x31] sm:$0xff]  ;;  %p4262_p0 = scmp.lt.s32.totalorder %s3452_s29, %s4260_s10  ;;  %p4263_p1 = scmp.lt.s32.totalorder %s4261_s19, %s4255_s8 }
  0x1e   : > { %v276_v21 = vld [vmem:[%s4411_s11 + $0xc9] sm:$0xff]  ;;  %3878 = vmatprep.mubr.msk.bf16.mxu1 %vm307_vm1, %v297_v11  ;;  %3859 = vmatmul.mubr.msk.bf16.vlgmr.msra.gmra.mxu0 %vm307_vm1, %v288_v12  ;;  %v289_v22 = vpack.c.bf16 %v256_v19, %v255_v16  ;;  %v258_v27 = vld [vmem:[%s4411_s11 + $0x39] sm:$0xff]  ;;  %v277_v28 = vld [vmem:[%s4411_s11 + $0xd1] sm:$0xff]  ;;  %p4258_p13 = pneg %p4257_p12 }
  0x1f   : > { %v299_v23 = vpack.c.bf16 %v276_v21, %v275_v20  ;;  %3879 = vmatmul.mubr.msk.bf16.vlgmr.msra.gmra.mxu1 %vm307_vm1, %v298_v17  ;;  %3933 = vmatpush3.bf16.msra.mxu0 %v888_v15  ;;  %v278_v29 = vld [vmem:[%s4411_s11 + $0xd9] sm:$0xff]  ;;  %v259_v30 = vld [vmem:[%s4411_s11 + $0x41] sm:$0xff]  ;;  %v260_v31 = vld [vmem:[%s4411_s11 + $0x49] sm:$0xff]  ;;  %v290_v34 = vpack.c.bf16 %v258_v27, %v257_v26  ;;  %p4264_p2 = por %p4263_p1, %p4262_p0 }
  0x20   : > { %3895 = vmatpush3.bf16.msra.mxu1 %v598_v18  ;;  %3862 = vmatprep.mubr.msk.bf16.mxu0 %vm307_vm1, %v289_v22  ;;  %v279_v32 = vld [vmem:[%s4411_s11 + $0xe1] sm:$0xff]  ;;  %v280_v33 = vld [vmem:[%s4411_s11 + $0xe9] sm:$0xff]  ;;  %v300_v35 = vpack.c.bf16 %v278_v29, %v277_v28  ;;  %v291_v36 = vpack.c.bf16 %v260_v31, %v259_v30  ;;  %v261_v38 = vld [vmem:[%s4411_s11 + $0x51] sm:$0xff]  ;;  %v1540_v22 = vsel %vm362_vm0, %v4438_v25, 0 }
  0x21   : > { %3882 = vmatprep.mubr.msk.bf16.mxu1 %vm307_vm1, %v299_v23  ;;  %4204 = vmatprep.subr.msk.bf16.mxu1 %vm362_vm0, %v4433_v24  ;;  %v301_v37 = vpack.c.bf16 %v280_v33, %v279_v32  ;;  %v262_v39 = vld [vmem:[%s4411_s11 + $0x59] sm:$0xff]  ;;  %v281_v40 = vld [vmem:[%s4411_s11 + $0xf1] sm:$0xff]  ;;  %v263_v42 = vld [vmem:[%s4411_s11 + $0x61] sm:$0xff]  ;;  %p4265_p3 = pnand %p4264_p2, %p4258_p13 }
  0x22   : > { %4205 = vmatprep.subr.msk.bf16.mxu0 %vm362_vm0, %v4438_v25  ;;  %v282_v41 = vld [vmem:[%s4411_s11 + $0xf9] sm:$0xff]  ;;  %v264_v43 = vld [vmem:[%s4411_s11 + $0x69] sm:$0xff]  ;;  %v283_v44 = vld [vmem:[%s4411_s11 + $0x101] sm:$0xff]  ;;  %v292_v46 = vpack.c.bf16 %v262_v39, %v261_v38 }
  0x23   : > { %v284_v45 = vld [vmem:[%s4411_s11 + $0x109] sm:$0xff]  ;;  %v302_v47 = vpack.c.bf16 %v282_v41, %v281_v40  ;;  %v293_v48 = vpack.c.bf16 %v264_v43, %v263_v42  ;;  %v265_v50 = vld [vmem:[%s4411_s11 + $0x71] sm:$0xff]  ;;  %v266_v51 = vld [vmem:[%s4411_s11 + $0x79] sm:$0xff] }
  0x24   : > { %v303_v49 = vpack.c.bf16 %v284_v45, %v283_v44  ;;  %v285_v52 = vld [vmem:[%s4411_s11 + $0x111] sm:$0xff]  ;;  %v286_v53 = vld [vmem:[%s4411_s11 + $0x119] sm:$0xff]  ;;  %v267_v54 = vld [vmem:[%s4411_s11 + $0x81] sm:$0xff]  ;;  %v294_v58 = vpack.c.bf16 %v266_v51, %v265_v50 }
  0x25   : > { %v268_v55 = vld [vmem:[%s4411_s11 + $0x89] sm:$0xff]  ;;  %v196_v56 = vld [vmem:[%s4411_s11] sm:$0xff]  ;;  %v304_v59 = vpack.c.bf16 %v286_v53, %v285_v52  ;;  %v269_v62 = vld [vmem:[%s4411_s11 + $0x91] sm:$0xff] }
  0x26   : > { %3863 = vmatmul.mubr.msk.bf16.gmra.mxu0 %vm307_vm1, %v290_v34  ;;  %v197_v57 = vld [vmem:[%s4411_s11 + $0x8] sm:$0xff]  ;;  %v295_v60 = vpack.c.bf16 %v268_v55, %v267_v54  ;;  %v270_v63 = vld [vmem:[%s4411_s11 + $0x99] sm:$0xff]  ;;  %v198_v0 = vld [vmem:[%s4411_s11 + $0x10] sm:$0xff] }
  0x27   : > { %3883 = vmatmul.mubr.msk.bf16.gmra.mxu1 %vm307_vm1, %v300_v35  ;;  %3866 = vmatprep.mubr.msk.bf16.mxu0 %vm307_vm1, %v291_v36  ;;  %v232_v61 = vpack.c.bf16 %v197_v57, %v196_v56  ;;  %v199_v1 = vld [vmem:[%s4411_s11 + $0x18] sm:$0xff]  ;;  %v777_v2 = vld [vmem:[%s4411_s11 + $0x2] sm:$0xff]  ;;  %v778_v3 = vld [vmem:[%s4411_s11 + $0xa] sm:$0xff]  ;;  %v296_v6 = vpack.c.bf16 %v270_v63, %v269_v62 }
  0x28   : > { %3886 = vmatprep.mubr.msk.bf16.mxu1 %vm307_vm1, %v301_v37  ;;  %v200_v4 = vld [vmem:[%s4411_s11 + $0x20] sm:$0xff]  ;;  %v201_v5 = vld [vmem:[%s4411_s11 + $0x28] sm:$0xff]  ;;  %v233_v7 = vpack.c.bf16 %v199_v1, %v198_v0  ;;  %v813_v8 = vpack.c.bf16 %v778_v3, %v777_v2  ;;  %v779_v12 = vld [vmem:[%s4411_s11 + $0x12] sm:$0xff] }
  0x29   : > { %v234_v9 = vpack.c.bf16 %v201_v5, %v200_v4  ;;  %v4497_v11 = vld [vmem:[%s5634_s1 + $0xa] sm:$0x3]  ;;  %v780_v13 = vld [vmem:[%s4411_s11 + $0x1a] sm:$0xff]  ;;  %v202_v14 = vld [vmem:[%s4411_s11 + $0x30] sm:$0xff] }
  0x2a   : > { %v203_v15 = vld [vmem:[%s4411_s11 + $0x38] sm:$0xff]  ;;  %v204_v16 = vld [vmem:[%s4411_s11 + $0x40] sm:$0xff]  ;;  %v205_v17 = vld [vmem:[%s4411_s11 + $0x48] sm:$0xff]  ;;  %v4512_v20 = vpack.c.bf16 %v780_v13, %v779_v12 }
  0x2b   : > { %v781_v18 = vld [vmem:[%s4411_s11 + $0x22] sm:$0xff]  ;;  %v782_v19 = vld [vmem:[%s4411_s11 + $0x2a] sm:$0xff]  ;;  %v235_v21 = vpack.c.bf16 %v203_v15, %v202_v14  ;;  %v236_v23 = vpack.c.bf16 %v205_v17, %v204_v16  ;;  %v783_v28 = vld [vmem:[%s4411_s11 + $0x32] sm:$0xff] }
  0x2c   : > { %v4516_v24 = vpack.c.bf16 %v782_v19, %v781_v18  ;;  %v4523_v26 = vld [vmem:[%s5634_s1 + $0xc] sm:$0x3]  ;;  %v206_v27 = vld [vmem:[%s4411_s11 + $0x50] sm:$0xff]  ;;  %v784_v29 = vld [vmem:[%s4411_s11 + $0x3a] sm:$0xff] }
  0x2d   : > { %v207_v25 = vld [vmem:[%s4411_s11 + $0x58] sm:$0xff]  ;;  %v785_v30 = vld [vmem:[%s4411_s11 + $0x42] sm:$0xff]  ;;  %v786_v31 = vld [vmem:[%s4411_s11 + $0x4a] sm:$0xff]  ;;  %v4539_v34 = vpack.c.bf16 %v784_v29, %v783_v28 }
  0x2e   : > { %3867 = vmatmul.mubr.msk.bf16.gmra.mxu0 %vm307_vm1, %v292_v46  ;;  %v208_v32 = vld [vmem:[%s4411_s11 + $0x60] sm:$0xff]  ;;  %v209_v33 = vld [vmem:[%s4411_s11 + $0x68] sm:$0xff]  ;;  %v237_v35 = vpack.c.bf16 %v207_v25, %v206_v27  ;;  %v4541_v36 = vpack.c.bf16 %v786_v31, %v785_v30  ;;  %v210_v38 = vld [vmem:[%s4411_s11 + $0x70] sm:$0xff] }
  0x2f   : > { %3887 = vmatmul.mubr.msk.bf16.gmra.mxu1 %vm307_vm1, %v302_v47  ;;  %3870 = vmatprep.mubr.msk.bf16.mxu0 %vm307_vm1, %v293_v48  ;;  %v238_v37 = vpack.c.bf16 %v209_v33, %v208_v32  ;;  %v787_v39 = vld [vmem:[%s4411_s11 + $0x52] sm:$0xff]  ;;  %v788_v40 = vld [vmem:[%s4411_s11 + $0x5a] sm:$0xff]  ;;  %v789_v42 = vld [vmem:[%s4411_s11 + $0x62] sm:$0xff] }
  0x30   : > { %3890 = vmatprep.mubr.msk.bf16.mxu1 %vm307_vm1, %v303_v49  ;;  %v211_v41 = vld [vmem:[%s4411_s11 + $0x78] sm:$0xff]  ;;  %v790_v43 = vld [vmem:[%s4411_s11 + $0x6a] sm:$0xff]  ;;  %v212_v44 = vld [vmem:[%s4411_s11 + $0x80] sm:$0xff]  ;;  %v4557_v46 = vpack.c.bf16 %v788_v40, %v787_v39 }
  0x31   : > { %v213_v45 = vld [vmem:[%s4411_s11 + $0x88] sm:$0xff]  ;;  %v239_v47 = vpack.c.bf16 %v211_v41, %v210_v38  ;;  %v4559_v48 = vpack.c.bf16 %v790_v43, %v789_v42  ;;  %v214_v50 = vld [vmem:[%s4411_s11 + $0x90] sm:$0xff]  ;;  %v792_v52 = vld [vmem:[%s4411_s11 + $0x7a] sm:$0xff] }
  0x32   : > { %v240_v49 = vpack.c.bf16 %v213_v45, %v212_v44  ;;  %v791_v51 = vld [vmem:[%s4411_s11 + $0x72] sm:$0xff]  ;;  %v793_v54 = vld [vmem:[%s4411_s11 + $0x82] sm:$0xff]  ;;  %v794_v55 = vld [vmem:[%s4411_s11 + $0x8a] sm:$0xff] }
  0x33   : > { %v215_v53 = vld [vmem:[%s4411_s11 + $0x98] sm:$0xff]  ;;  %v216_v56 = vld [vmem:[%s4411_s11 + $0xa0] sm:$0xff]  ;;  %v217_v57 = vld [vmem:[%s4411_s11 + $0xa8] sm:$0xff] }
  0x34   : > { %v218_v62 = vld [vmem:[%s4411_s11 + $0xb0] sm:$0xff]  ;;  %v796_v0 = vld [vmem:[%s4411_s11 + $0x9a] sm:$0xff]  ;;  %v797_v2 = vld [vmem:[%s4411_s11 + $0xa2] sm:$0xff] }
  0x35   : > { %v795_v63 = vld [vmem:[%s4411_s11 + $0x92] sm:$0xff]  ;;  %v798_v3 = vld [vmem:[%s4411_s11 + $0xaa] sm:$0xff]  ;;  %v220_v4 = vld [vmem:[%s4411_s11 + $0xc0] sm:$0xff] }
  0x36   : > { %3871 = vmatmul.mubr.msk.bf16.gmra.mxu0 %vm307_vm1, %v294_v58  ;;  %v4575_v58 = vpack.c.bf16 %v792_v52, %v791_v51  ;;  %v219_v1 = vld [vmem:[%s4411_s11 + $0xb8] sm:$0xff]  ;;  %v221_v5 = vld [vmem:[%s4411_s11 + $0xc8] sm:$0xff]  ;;  %v224_v17 = vld [vmem:[%s4411_s11 + $0xe0] sm:$0xff] }
  0x37   : > { %3891 = vmatmul.mubr.msk.bf16.gmra.mxu1 %vm307_vm1, %v304_v59  ;;  %3874 = vmatprep.mubr.msk.bf16.mxu0 %vm307_vm1, %v295_v60  ;;  %v241_v59 = vpack.c.bf16 %v215_v53, %v214_v50  ;;  %v4577_v60 = vpack.c.bf16 %v794_v55, %v793_v54  ;;  %v799_v12 = vld [vmem:[%s4411_s11 + $0xb2] sm:$0xff]  ;;  %v800_v13 = vld [vmem:[%s4411_s11 + $0xba] sm:$0xff]  ;;  %v801_v15 = vld [vmem:[%s4411_s11 + $0xc2] sm:$0xff] }
  0x38   : > { %3896 = vmatprep.mubr.msk.bf16.mxu1 %vm307_vm1, %v232_v61  ;;  %v242_v61 = vpack.c.bf16 %v217_v57, %v216_v56  ;;  %v223_v14 = vld [vmem:[%s4411_s11 + $0xd8] sm:$0xff]  ;;  %v802_v16 = vld [vmem:[%s4411_s11 + $0xca] sm:$0xff]  ;;  %v4611_v19 = vpack.c.bf16 %v800_v13, %v799_v12  ;;  %v805_v30 = vld [vmem:[%s4411_s11 + $0xe2] sm:$0xff]  ;;  %v1866_v57 = vsel %vm362_vm0, %v4497_v11, 0 }
  0x39   : > { %v225_v18 = vld [vmem:[%s4411_s11 + $0xe8] sm:$0xff]  ;;  %v226_v27 = vld [vmem:[%s4411_s11 + $0xf0] sm:$0xff]  ;;  %v804_v29 = vld [vmem:[%s4411_s11 + $0xda] sm:$0xff] }
  0x3a   : > { %v803_v28 = vld [vmem:[%s4411_s11 + $0xd2] sm:$0xff]  ;;  %v806_v31 = vld [vmem:[%s4411_s11 + $0xea] sm:$0xff]  ;;  %v228_v32 = vld [vmem:[%s4411_s11 + $0x100] sm:$0xff] }
  0x3b   : > { %v227_v25 = vld [vmem:[%s4411_s11 + $0xf8] sm:$0xff]  ;;  %v229_v33 = vld [vmem:[%s4411_s11 + $0x108] sm:$0xff]  ;;  %v4631_v38 = vpack.c.bf16 %v806_v31, %v805_v30  ;;  %v230_v40 = vld [vmem:[%s4411_s11 + $0x110] sm:$0xff] }
  0x3c   : > { %v248_v39 = vpack.c.bf16 %v229_v33, %v228_v32  ;;  %v807_v41 = vld [vmem:[%s4411_s11 + $0xf2] sm:$0xff]  ;;  %v808_v42 = vld [vmem:[%s4411_s11 + $0xfa] sm:$0xff]  ;;  %v809_v44 = vld [vmem:[%s4411_s11 + $0x102] sm:$0xff] }
  0x3d   : > { %v231_v43 = vld [vmem:[%s4411_s11 + $0x118] sm:$0xff]  ;;  %v810_v45 = vld [vmem:[%s4411_s11 + $0x10a] sm:$0xff]  ;;  %v3142_v31 = vld [vmem:[%s5636_s3 + $0x20] sm:$0xff] }
  0x3e   : > { %3875 = vmatmul.mubr.msk.bf16.gmra.mxu0 %vm307_vm1, %v296_v6  ;;  %v4593_v6 = vpack.c.bf16 %v796_v0, %v795_v63  ;;  %v4647_v50 = vpack.c.bf16 %v810_v45, %v809_v44  ;;  %v811_v51 = vld [vmem:[%s4411_s11 + $0x112] sm:$0xff]  ;;  %v812_v52 = vld [vmem:[%s4411_s11 + $0x11a] sm:$0xff] }
  0x3f   : > { %3897 = vmatmul.mubr.msk.bf16.vlgmr.msra.gmra.mxu1 %vm307_vm1, %v233_v7  ;;  %3934 = vmatprep.mubr.msk.bf16.mxu0 %vm307_vm1, %v813_v8  ;;  %v243_v7 = vpack.c.bf16 %v219_v1, %v218_v62  ;;  %v4595_v8 = vpack.c.bf16 %v798_v3, %v797_v2  ;;  %v1429_v53 = vld [vmem:[%s4411_s11 + $0x13] sm:$0xff]  ;;  %v1430_v54 = vld [vmem:[%s4411_s11 + $0x1b] sm:$0xff]  ;;  %v4660_v55 = vpack.c.bf16 %v812_v52, %v811_v51  ;;  %v4688_v1 = vld [vmem:[%s5634_s1 + $0x10] sm:$0x3] }
  0x40   : > { %3971 = vmatpush3.bf16.msra.mxu1 %v1214_v10  ;;  %3900 = vmatprep.mubr.msk.bf16.mxu1 %vm307_vm1, %v234_v9  ;;  %v244_v9 = vpack.c.bf16 %v221_v5, %v220_v4  ;;  %v222_v10 = vld [vmem:[%s4411_s11 + $0xd0] sm:$0xff]  ;;  %v1465_v56 = vpack.c.bf16 %v1430_v54, %v1429_v53  ;;  %v1434_v62 = vld [vmem:[%s4411_s11 + $0x3b] sm:$0xff]  ;;  %v3147_v51 = vld [vmem:[%s5636_s3 + $0x48] sm:$0xff] }
  0x41   : > { %4206 = vmatprep.subr.msk.bf16.mxu1 %vm362_vm0, %v4497_v11  ;;  %v1433_v11 = vld [vmem:[%s4411_s11 + $0x33] sm:$0xff]  ;;  %v1436_v2 = vld [vmem:[%s4411_s11 + $0x4b] sm:$0xff]  ;;  %v1438_v3 = vld [vmem:[%s4411_s11 + $0x5b] sm:$0xff] }
  0x42   : > { %v1467_v0 = vpack.c.bf16 %v1434_v62, %v1433_v11  ;;  %v1444_v13 = vld [vmem:[%s4411_s11 + $0x8b] sm:$0xff]  ;;  %v3141_v30 = vld [vmem:[%s5636_s3 + $0x18] sm:$0xff]  ;;  %v1459_v53 = vld [vmem:[%s4411_s11 + $0x103] sm:$0xff] }
  0x43   : > { %v1453_v32 = vld [vmem:[%s4411_s11 + $0xd3] sm:$0xff]  ;;  %v1454_v33 = vld [vmem:[%s4411_s11 + $0xdb] sm:$0xff]  ;;  %v1460_v54 = vld [vmem:[%s4411_s11 + $0x10b] sm:$0xff] }
  0x44   : > { %v1457_v44 = vld [vmem:[%s4411_s11 + $0xf3] sm:$0xff]  ;;  %v1458_v45 = vld [vmem:[%s4411_s11 + $0xfb] sm:$0xff] }
  0x45   : > { %v3148_v52 = vld [vmem:[%s5636_s3 + $0x50] sm:$0xff]  ;;  %v1462_v11 = vld [vmem:[%s4411_s11 + $0x11b] sm:$0xff] }
  0x46   : > { %3935 = vmatmul.mubr.msk.bf16.vlgmr.msra.gmra.mxu0 %vm307_vm1, %v4512_v20  ;;  %v1756_v62 = vld [vmem:[%s4411_s11 + $0x1c] sm:$0xff] }
  0x47   : > { %3901 = vmatmul.mubr.msk.bf16.gmra.mxu1 %vm307_vm1, %v235_v21  ;;  %4009 = vmatpush3.bf16.msra.mxu0 %v1540_v22  ;;  %v245_v21 = vpack.c.bf16 %v223_v14, %v222_v10  ;;  %v4613_v22 = vpack.c.bf16 %v802_v16, %v801_v15  ;;  %v1446_v14 = vld [vmem:[%s4411_s11 + $0x9b] sm:$0xff] }
  0x48   : > { %3904 = vmatprep.mubr.msk.bf16.mxu1 %vm307_vm1, %v236_v23  ;;  %3938 = vmatprep.mubr.msk.bf16.mxu0 %vm307_vm1, %v4516_v24  ;;  %v246_v23 = vpack.c.bf16 %v225_v18, %v224_v17  ;;  %v1448_v17 = vld [vmem:[%s4411_s11 + $0xab] sm:$0xff]  ;;  %v3138_v18 = vld [vmem:[%s5636_s3] sm:$0xff] }
  0x49   : > { %4207 = vmatprep.subr.msk.bf16.mxu0 %vm362_vm0, %v4523_v26 }
  0x4e   : > { %3939 = vmatmul.mubr.msk.bf16.gmra.mxu0 %vm307_vm1, %v4539_v34 }
  0x4f   : > { %3905 = vmatmul.mubr.msk.bf16.gmra.mxu1 %vm307_vm1, %v237_v35  ;;  %3942 = vmatprep.mubr.msk.bf16.mxu0 %vm307_vm1, %v4541_v36  ;;  %v4629_v35 = vpack.c.bf16 %v804_v29, %v803_v28  ;;  %v3140_v28 = vld [vmem:[%s5636_s3 + $0x10] sm:$0xff]  ;;  %v3139_v29 = vld [vmem:[%s5636_s3 + $0x8] sm:$0xff] }
  0x50   : > { %3908 = vmatprep.mubr.msk.bf16.mxu1 %vm307_vm1, %v238_v37  ;;  %v247_v37 = vpack.c.bf16 %v227_v25, %v226_v27  ;;  %v1452_v25 = vld [vmem:[%s4411_s11 + $0xcb] sm:$0xff] }
  0x56   : > { %3943 = vmatmul.mubr.msk.bf16.gmra.mxu0 %vm307_vm1, %v4557_v46 }
  0x57   : > { %3909 = vmatmul.mubr.msk.bf16.gmra.mxu1 %vm307_vm1, %v239_v47  ;;  %3946 = vmatprep.mubr.msk.bf16.mxu0 %vm307_vm1, %v4559_v48  ;;  %v4645_v47 = vpack.c.bf16 %v808_v42, %v807_v41  ;;  %v1456_v41 = vld [vmem:[%s4411_s11 + $0xeb] sm:$0xff]  ;;  %v3145_v42 = vld [vmem:[%s5636_s3 + $0x38] sm:$0xff] }
  0x58   : > { %3912 = vmatprep.mubr.msk.bf16.mxu1 %vm307_vm1, %v240_v49  ;;  %v249_v49 = vpack.c.bf16 %v231_v43, %v230_v40  ;;  %v3144_v40 = vld [vmem:[%s5636_s3 + $0x30] sm:$0xff]  ;;  %v3146_v43 = vld [vmem:[%s5636_s3 + $0x40] sm:$0xff] }
  0x5e   : > { %3947 = vmatmul.mubr.msk.bf16.gmra.mxu0 %vm307_vm1, %v4575_v58 }
  0x5f   : > { %3913 = vmatmul.mubr.msk.bf16.gmra.mxu1 %vm307_vm1, %v241_v59  ;;  %3950 = vmatprep.mubr.msk.bf16.mxu0 %vm307_vm1, %v4577_v60  ;;  %v4669_v59 = vld [vmem:[%s5634_s1 + $0xe] sm:$0x3] }
  0x60   : > { %3916 = vmatprep.mubr.msk.bf16.mxu1 %vm307_vm1, %v242_v61  ;;  %v1432_v61 = vld [vmem:[%s4411_s11 + $0x2b] sm:$0xff] }
  0x66   : > { %3951 = vmatmul.mubr.msk.bf16.gmra.mxu0 %vm307_vm1, %v4593_v6 }
  0x67   : > { %3917 = vmatmul.mubr.msk.bf16.gmra.mxu1 %vm307_vm1, %v243_v7  ;;  %3954 = vmatprep.mubr.msk.bf16.mxu0 %vm307_vm1, %v4595_v8  ;;  %v1441_v7 = vld [vmem:[%s4411_s11 + $0x73] sm:$0xff] }
  0x68   : > { %3920 = vmatprep.mubr.msk.bf16.mxu1 %vm307_vm1, %v244_v9  ;;  %v1442_v9 = vld [vmem:[%s4411_s11 + $0x7b] sm:$0xff] }
  0x69   : > { %v1471_v12 = vpack.c.bf16 %v1442_v9, %v1441_v7  ;;  %v1759_v7 = vld [vmem:[%s4411_s11 + $0x34] sm:$0xff]  ;;  %v1760_v9 = vld [vmem:[%s4411_s11 + $0x3c] sm:$0xff] }
  0x6e   : > { %3955 = vmatmul.mubr.msk.bf16.gmra.mxu0 %vm307_vm1, %v4611_v19 }
  0x6f   : > { %3921 = vmatmul.mubr.msk.bf16.gmra.mxu1 %vm307_vm1, %v245_v21  ;;  %3958 = vmatprep.mubr.msk.bf16.mxu0 %vm307_vm1, %v4613_v22  ;;  %v1450_v21 = vld [vmem:[%s4411_s11 + $0xbb] sm:$0xff] }
  0x70   : > { %3924 = vmatprep.mubr.msk.bf16.mxu1 %vm307_vm1, %v246_v23  ;;  %v4317_v23 = vmov 0  }
  0x71   : > { %4251 = vset.pattern.permute.xlu0 %v4317_v23  ;;  %4252 = vset.pattern.permute.xlu1 %v4317_v23  ;;  %v3160_v23 = vld [vmem:[%s5636_s3 + $0xb0] sm:$0xff] }
  0x72   : > { %3176 = vperm.xlu0 %4251, %v3138_v18   ;;  %3186 = vperm.xlu1 %4252, %v3140_v28   ;;  %v1764_v18 = vld [vmem:[%s4411_s11 + $0x5c] sm:$0xff] }
  0x73   : > { %v3161_v28 = vld [vmem:[%s5636_s3 + $0xb8] sm:$0xff] }
  0x76   : > { %3959 = vmatmul.mubr.msk.bf16.gmra.mxu0 %vm307_vm1, %v4629_v35  ;;  %3181 = vperm.xlu0 %4251, %v3139_v29   ;;  %v3162_v29 = vld [vmem:[%s5636_s3 + $0xc0] sm:$0xff] }
  0x77   : > { %3925 = vmatmul.mubr.msk.bf16.gmra.mxu1 %vm307_vm1, %v247_v37  ;;  %3962 = vmatprep.mubr.msk.bf16.mxu0 %vm307_vm1, %v4631_v38  ;;  %v1477_v37 = vpack.c.bf16 %v1454_v33, %v1453_v32  ;;  %v3163_v32 = vld [vmem:[%s5636_s3 + $0xc8] sm:$0xff]  ;;  %v3164_v33 = vld [vmem:[%s5636_s3 + $0xd0] sm:$0xff] }
  0x78   : > { %3928 = vmatprep.mubr.msk.bf16.mxu1 %vm307_vm1, %v248_v39  ;;  %3191 = vperm.xlu1 %4252, %v3141_v30   ;;  %v3143_v39 = vld [vmem:[%s5636_s3 + $0x28] sm:$0xff]  ;;  %v1768_v30 = vld [vmem:[%s4411_s11 + $0x7c] sm:$0xff] }
  0x7a   : > { %3196 = vperm.xlu0 %4251, %v3142_v31  }
  0x7c   : > { %3201 = vperm.xlu1 %4252, %v3143_v39  }
  0x7e   : > { %3963 = vmatmul.mubr.msk.bf16.gmra.mxu0 %vm307_vm1, %v4645_v47  ;;  %3206 = vperm.xlu0 %4251, %v3144_v40   ;;  %v3165_v40 = vld [vmem:[%s5636_s3 + $0xd8] sm:$0xff] }
  0x7f   : > { %3929 = vmatmul.mubr.msk.bf16.gmra.mxu1 %vm307_vm1, %v249_v49  ;;  %3966 = vmatprep.mubr.msk.bf16.mxu0 %vm307_vm1, %v4647_v50  ;;  %v1479_v49 = vpack.c.bf16 %v1458_v45, %v1457_v44  ;;  %v1771_v45 = vld [vmem:[%s4411_s11 + $0x94] sm:$0xff] }
  0x80   : > { %3972 = vmatprep.mubr.msk.bf16.mxu1 %vm307_vm1, %v4512_v20  ;;  %v1431_v20 = vld [vmem:[%s4411_s11 + $0x23] sm:$0xff]  ;;  %3211 = vperm.xlu1 %4252, %v3145_v42  }
  0x81   : > { %v1466_v63 = vpack.c.bf16 %v1432_v61, %v1431_v20  ;;  %v1138_v20 = vld [vmem:[%s4411_s11 + $0x12a] sm:$0xff]  ;;  %v1461_v61 = vld [vmem:[%s4411_s11 + $0x113] sm:$0xff] }
  0x82   : > { %3216 = vperm.xlu0 %4251, %v3146_v43   ;;  %v1769_v42 = vld [vmem:[%s4411_s11 + $0x84] sm:$0xff]  ;;  %v1770_v43 = vld [vmem:[%s4411_s11 + $0x8c] sm:$0xff] }
  0x84   : > { %3221 = vperm.xlu1 %4252, %v3147_v51  }
  0x86   : > { %3967 = vmatmul.mubr.msk.bf16.gmra.mxu0 %vm307_vm1, %v4660_v55  ;;  %3226 = vperm.xlu0 %4251, %v3148_v52   ;;  %v1798_v52 = vpack.c.bf16 %v1770_v43, %v1769_v42 }
  0x87   : > { %3973 = vmatmul.mubr.msk.bf16.vlgmr.msra.gmra.mxu1 %vm307_vm1, %v4516_v24  ;;  %4010 = vmatprep.mubr.msk.bf16.mxu0 %vm307_vm1, %v1465_v56  ;;  %v2192_v24 = vsel %vm362_vm0, %v4523_v26, 0  ;;  %v1437_v26 = vld [vmem:[%s4411_s11 + $0x53] sm:$0xff] }
  0x88   : > { %4047 = vmatpush3.bf16.msra.mxu1 %v1866_v57  ;;  %3976 = vmatprep.mubr.msk.bf16.mxu1 %vm307_vm1, %v4539_v34  ;;  %v1435_v34 = vld [vmem:[%s4411_s11 + $0x43] sm:$0xff]  ;;  %v1469_v5 = vpack.c.bf16 %v1438_v3, %v1437_v26  ;;  %v3149_v56 = vld [vmem:[%s5636_s3 + $0x58] sm:$0xff]  ;;  %v1464_v3 = vld [vmem:[%s4411_s11 + $0x12b] sm:$0xff] }
  0x89   : > { %4208 = vmatprep.subr.msk.bf16.mxu1 %vm362_vm0, %v4669_v59  ;;  %v1468_v4 = vpack.c.bf16 %v1436_v2, %v1435_v34  ;;  %v3150_v57 = vld [vmem:[%s5636_s3 + $0x60] sm:$0xff]  ;;  %3231 = vperm.xlu1 %4252, %v3149_v56   ;;  %v3151_v34 = vld [vmem:[%s5636_s3 + $0x68] sm:$0xff] }
  0x8a   : > { %3236 = vperm.xlu0 %4251, %v3150_v57   ;;  %v1463_v26 = vld [vmem:[%s4411_s11 + $0x123] sm:$0xff] }
  0x8d   : > { %3241 = vperm.xlu1 %4252, %v3151_v34   ;;  %v1775_v34 = vld [vmem:[%s4411_s11 + $0xb4] sm:$0xff] }
  0x8e   : > { %4011 = vmatmul.mubr.msk.bf16.vlgmr.msra.gmra.mxu0 %vm307_vm1, %v1466_v63  ;;  %v1480_v63 = vpack.c.bf16 %v1460_v54, %v1459_v53  ;;  %v3168_v53 = vld [vmem:[%s5636_s3 + $0xf0] sm:$0xff] }
  0x8f   : > { %3977 = vmatmul.mubr.msk.bf16.gmra.mxu1 %vm307_vm1, %v4541_v36  ;;  %4085 = vmatpush3.bf16.msra.mxu0 %v2192_v24  ;;  %v1439_v36 = vld [vmem:[%s4411_s11 + $0x63] sm:$0xff] }
  0x90   : > { %3980 = vmatprep.mubr.msk.bf16.mxu1 %vm307_vm1, %v4557_v46  ;;  %4014 = vmatprep.mubr.msk.bf16.mxu0 %vm307_vm1, %v1467_v0  ;;  %v1440_v46 = vld [vmem:[%s4411_s11 + $0x6b] sm:$0xff]  ;;  %v1481_v0 = vpack.c.bf16 %v1462_v11, %v1461_v61  ;;  %v3169_v11 = vld [vmem:[%s5636_s3 + $0xf8] sm:$0xff] }
  0x91   : > { %4209 = vmatprep.subr.msk.bf16.mxu0 %vm362_vm0, %v4688_v1  ;;  %v1470_v10 = vpack.c.bf16 %v1440_v46, %v1439_v36  ;;  %v1757_v36 = vld [vmem:[%s4411_s11 + $0x24] sm:$0xff]  ;;  %v1758_v46 = vld [vmem:[%s4411_s11 + $0x2c] sm:$0xff] }
  0x96   : > { %4015 = vmatmul.mubr.msk.bf16.gmra.mxu0 %vm307_vm1, %v1468_v4  ;;  %v3153_v4 = vld [vmem:[%s5636_s3 + $0x78] sm:$0xff] }
  0x97   : > { %3981 = vmatmul.mubr.msk.bf16.gmra.mxu1 %vm307_vm1, %v4559_v48  ;;  %4018 = vmatprep.mubr.msk.bf16.mxu0 %vm307_vm1, %v1469_v5  ;;  %v1443_v48 = vld [vmem:[%s4411_s11 + $0x83] sm:$0xff] }
  0x98   : > { %3984 = vmatprep.mubr.msk.bf16.mxu1 %vm307_vm1, %v4575_v58  ;;  %v1445_v58 = vld [vmem:[%s4411_s11 + $0x93] sm:$0xff]  ;;  %v1472_v15 = vpack.c.bf16 %v1444_v13, %v1443_v48  ;;  %v3154_v5 = vld [vmem:[%s5636_s3 + $0x80] sm:$0xff]  ;;  %3251 = vperm.xlu1 %4252, %v3153_v4   ;;  %v3155_v48 = vld [vmem:[%s5636_s3 + $0x88] sm:$0xff] }
  0x99   : > { %v1473_v16 = vpack.c.bf16 %v1446_v14, %v1445_v58  ;;  %v3156_v13 = vld [vmem:[%s5636_s3 + $0x90] sm:$0xff]  ;;  %v1793_v58 = vpack.c.bf16 %v1760_v9, %v1759_v7  ;;  %v2518_v14 = vsel %vm362_vm0, %v4669_v59, 0  ;;  %v3171_v4 = vld [vmem:[%s5636_s3 + $0x108] sm:$0xff] }
  0x9a   : > { %v1762_v59 = vld [vmem:[%s4411_s11 + $0x4c] sm:$0xff] }
  0x9c   : > { %3261 = vperm.xlu1 %4252, %v3155_v48  }
  0x9e   : > { %4019 = vmatmul.mubr.msk.bf16.gmra.mxu0 %vm307_vm1, %v1470_v10  ;;  %v1482_v10 = vpack.c.bf16 %v1464_v3, %v1463_v26 }
  0x9f   : > { %3985 = vmatmul.mubr.msk.bf16.gmra.mxu1 %vm307_vm1, %v4577_v60  ;;  %4022 = vmatprep.mubr.msk.bf16.mxu0 %vm307_vm1, %v1471_v12  ;;  %v1447_v60 = vld [vmem:[%s4411_s11 + $0xa3] sm:$0xff]  ;;  %v1792_v12 = vpack.c.bf16 %v1758_v46, %v1757_v36 }
  0xa0   : > { %3988 = vmatprep.mubr.msk.bf16.mxu1 %vm307_vm1, %v4593_v6  ;;  %v1449_v6 = vld [vmem:[%s4411_s11 + $0xb3] sm:$0xff] }
  0xa1   : > { %v1475_v27 = vpack.c.bf16 %v1450_v21, %v1449_v6  ;;  %v3159_v21 = vld [vmem:[%s5636_s3 + $0xa8] sm:$0xff] }
  0xa6   : > { %4023 = vmatmul.mubr.msk.bf16.gmra.mxu0 %vm307_vm1, %v1472_v15  ;;  %v3157_v15 = vld [vmem:[%s5636_s3 + $0x98] sm:$0xff] }
  0xa7   : > { %3989 = vmatmul.mubr.msk.bf16.gmra.mxu1 %vm307_vm1, %v4595_v8  ;;  %4026 = vmatprep.mubr.msk.bf16.mxu0 %vm307_vm1, %v1473_v16  ;;  %v1474_v8 = vpack.c.bf16 %v1448_v17, %v1447_v60  ;;  %v3158_v16 = vld [vmem:[%s5636_s3 + $0xa0] sm:$0xff]  ;;  %v1763_v17 = vld [vmem:[%s4411_s11 + $0x54] sm:$0xff] }
  0xa8   : > { %3992 = vmatprep.mubr.msk.bf16.mxu1 %vm307_vm1, %v4611_v19  ;;  %v1451_v19 = vld [vmem:[%s4411_s11 + $0xc3] sm:$0xff]  ;;  %3271 = vperm.xlu1 %4252, %v3157_v15   ;;  %v1779_v15 = vld [vmem:[%s4411_s11 + $0xd4] sm:$0xff] }
  0xa9   : > { %v1761_v60 = vld [vmem:[%s4411_s11 + $0x44] sm:$0xff] }
  0xaa   : > { %v1794_v6 = vpack.c.bf16 %v1762_v59, %v1761_v60 }
  0xac   : > { %3281 = vperm.xlu1 %4252, %v3159_v21  }
  0xae   : > { %4027 = vmatmul.mubr.msk.bf16.gmra.mxu0 %vm307_vm1, %v1474_v8  ;;  %v2844_v8 = vsel %vm362_vm0, %v4688_v1, 0  ;;  %v1765_v1 = vld [vmem:[%s4411_s11 + $0x64] sm:$0xff] }
  0xaf   : > { %3993 = vmatmul.mubr.msk.bf16.gmra.mxu1 %vm307_vm1, %v4613_v22  ;;  %4030 = vmatprep.mubr.msk.bf16.mxu0 %vm307_vm1, %v1475_v27  ;;  %v1476_v22 = vpack.c.bf16 %v1452_v25, %v1451_v19  ;;  %v1795_v27 = vpack.c.bf16 %v1764_v18, %v1763_v17  ;;  %v1766_v19 = vld [vmem:[%s4411_s11 + $0x6c] sm:$0xff]  ;;  %v1767_v25 = vld [vmem:[%s4411_s11 + $0x74] sm:$0xff] }
  0xb0   : > { %3996 = vmatprep.mubr.msk.bf16.mxu1 %vm307_vm1, %v4629_v35  ;;  %v1455_v35 = vld [vmem:[%s4411_s11 + $0xe3] sm:$0xff]  ;;  %3291 = vperm.xlu1 %4252, %v3161_v28   ;;  %v1796_v31 = vpack.c.bf16 %v1766_v19, %v1765_v1  ;;  %v1783_v19 = vld [vmem:[%s4411_s11 + $0xf4] sm:$0xff] }
  0xb1   : > { %v1781_v28 = vld [vmem:[%s4411_s11 + $0xe4] sm:$0xff] }
  0xb4   : > { %3301 = vperm.xlu1 %4252, %v3163_v32  }
  0xb6   : > { %4031 = vmatmul.mubr.msk.bf16.gmra.mxu0 %vm307_vm1, %v1476_v22  ;;  %v1797_v22 = vpack.c.bf16 %v1768_v30, %v1767_v25  ;;  %v1784_v25 = vld [vmem:[%s4411_s11 + $0xfc] sm:$0xff] }
  0xb7   : > { %3997 = vmatmul.mubr.msk.bf16.gmra.mxu1 %vm307_vm1, %v4631_v38  ;;  %4034 = vmatprep.mubr.msk.bf16.mxu0 %vm307_vm1, %v1477_v37  ;;  %v1478_v38 = vpack.c.bf16 %v1456_v41, %v1455_v35  ;;  %v3166_v35 = vld [vmem:[%s5636_s3 + $0xe0] sm:$0xff] }
  0xb8   : > { %4000 = vmatprep.mubr.msk.bf16.mxu1 %vm307_vm1, %v4645_v47  ;;  %v1137_v47 = vld [vmem:[%s4411_s11 + $0x122] sm:$0xff]  ;;  %3311 = vperm.xlu1 %4252, %v3165_v40  }
  0xb9   : > { %v1156_v24 = vpack.c.bf16 %v1138_v20, %v1137_v47  ;;  %v3167_v47 = vld [vmem:[%s5636_s3 + $0xe8] sm:$0xff] }
  0xbc   : > { %3321 = vperm.xlu1 %4252, %v3167_v47  }
  0xbe   : > { %4035 = vmatmul.mubr.msk.bf16.gmra.mxu0 %vm307_vm1, %v1478_v38  ;;  %v1772_v38 = vld [vmem:[%s4411_s11 + $0x9c] sm:$0xff] }
  0xbf   : > { %4001 = vmatmul.mubr.msk.bf16.gmra.mxu1 %vm307_vm1, %v4647_v50  ;;  %4038 = vmatprep.mubr.msk.bf16.mxu0 %vm307_vm1, %v1479_v49  ;;  %v1755_v50 = vld [vmem:[%s4411_s11 + $0x14] sm:$0xff]  ;;  %v1799_v56 = vpack.c.bf16 %v1772_v38, %v1771_v45  ;;  %v1785_v38 = vld [vmem:[%s4411_s11 + $0x104] sm:$0xff] }
  0xc0   : > { %4004 = vmatprep.mubr.msk.bf16.mxu1 %vm307_vm1, %v4660_v55  ;;  %v3152_v55 = vld [vmem:[%s5636_s3 + $0x70] sm:$0xff]  ;;  %v1791_v2 = vpack.c.bf16 %v1756_v62, %v1755_v50  ;;  %v3170_v50 = vld [vmem:[%s5636_s3 + $0x100] sm:$0xff]  ;;  %3331 = vperm.xlu1 %4252, %v3169_v11  }
  0xc1   : > { %3246 = vperm.xlu0 %4251, %v3152_v55   ;;  %v1776_v55 = vld [vmem:[%s4411_s11 + $0xbc] sm:$0xff] }
  0xc2   : > { %v1801_v46 = vpack.c.bf16 %v1776_v55, %v1775_v34 }
  0xc4   : > { %3341 = vperm.xlu1 %4252, %v3171_v4  }
  0xc5   : > { %3256 = vperm.xlu0 %4251, %v3154_v5   ;;  %v3172_v5 = vld [vmem:[%s5636_s3 + $0x110] sm:$0xff] }
  0xc6   : > { %4039 = vmatmul.mubr.msk.bf16.gmra.mxu0 %vm307_vm1, %v1480_v63  ;;  %v1773_v63 = vld [vmem:[%s4411_s11 + $0xa4] sm:$0xff] }
  0xc7   : > { %4005 = vmatmul.mubr.msk.bf16.gmra.mxu1 %vm307_vm1, %v1156_v24  ;;  %4042 = vmatprep.mubr.msk.bf16.mxu0 %vm307_vm1, %v1481_v0  ;;  %v1774_v24 = vld [vmem:[%s4411_s11 + $0xac] sm:$0xff] }
  0xc8   : > { %4048 = vmatprep.mubr.msk.bf16.mxu1 %vm307_vm1, %v1791_v2  ;;  %v1800_v3 = vpack.c.bf16 %v1774_v24, %v1773_v63 }
  0xc9   : > { %3266 = vperm.xlu0 %4251, %v3156_v13   ;;  %v1777_v13 = vld [vmem:[%s4411_s11 + $0xc4] sm:$0xff] }
  0xcd   : > { %3276 = vperm.xlu0 %4251, %v3158_v16   ;;  %v1780_v16 = vld [vmem:[%s4411_s11 + $0xdc] sm:$0xff] }
  0xce   : > { %4043 = vmatmul.mubr.msk.bf16.gmra.mxu0 %vm307_vm1, %v1482_v10 }
  0xcf   : > { %4049 = vmatmul.mubr.msk.bf16.vlgmr.msra.gmra.mxu1 %vm307_vm1, %v1792_v12  ;;  %4086 = vmatprep.mubr.msk.bf16.mxu0 %vm307_vm1, %v1792_v12  ;;  %v3173_v12 = vld [vmem:[%s5636_s3 + $0x118] sm:$0xff] }
  0xd0   : > { %4123 = vmatpush3.bf16.msra.mxu1 %v2518_v14  ;;  %4052 = vmatprep.mubr.msk.bf16.mxu1 %vm307_vm1, %v1793_v58 }
  0xd1   : > { %3286 = vperm.xlu0 %4251, %v3160_v23   ;;  %3351 = vperm.xlu1 %4252, %v3173_v12  }
  0xd5   : > { %3296 = vperm.xlu0 %4251, %v3162_v29   ;;  %v1782_v29 = vld [vmem:[%s4411_s11 + $0xec] sm:$0xff] }
  0xd6   : > { %4087 = vmatmul.mubr.msk.bf16.vlgmr.msra.gmra.mxu0 %vm307_vm1, %v1793_v58  ;;  %v1778_v58 = vld [vmem:[%s4411_s11 + $0xcc] sm:$0xff]  ;;  %v1804_v32 = vpack.c.bf16 %v1782_v29, %v1781_v28 }
  0xd7   : > { %4053 = vmatmul.mubr.msk.bf16.gmra.mxu1 %vm307_vm1, %v1794_v6  ;;  %4161 = vmatpush3.bf16.msra.mxu0 %v2844_v8  ;;  %v1802_v17 = vpack.c.bf16 %v1778_v58, %v1777_v13  ;;  %v1789_v13 = vld [vmem:[%s4411_s11 + $0x124] sm:$0xff]  ;;  %v1790_v58 = vld [vmem:[%s4411_s11 + $0x12c] sm:$0xff] }
  0xd8   : > { %4056 = vmatprep.mubr.msk.bf16.mxu1 %vm307_vm1, %v1795_v27  ;;  %4090 = vmatprep.mubr.msk.bf16.mxu0 %vm307_vm1, %v1794_v6  ;;  %v1803_v6 = vpack.c.bf16 %v1780_v16, %v1779_v15 }
  0xd9   : > { %3306 = vperm.xlu0 %4251, %v3164_v33  }
  0xdd   : > { %3316 = vperm.xlu0 %4251, %v3166_v35  }
  0xde   : > { %v4876_v37 = vpop.f32.mrf.mxu0  ;;  %4091 = vmatmul.mubr.msk.bf16.gmra.mxu0 %vm307_vm1, %v1795_v27 }
  0xdf   : > { %v4879_v39 = vpop.f32.mrf.mxu1  ;;  %4057 = vmatmul.mubr.msk.bf16.gmra.mxu1 %vm307_vm1, %v1796_v31  ;;  %4094 = vmatprep.mubr.msk.bf16.mxu0 %vm307_vm1, %v1796_v31 }
  0xe0   : > { %v4889_v41 = vpop.f32.mrf.mxu0  ;;  %4060 = vmatprep.mubr.msk.bf16.mxu1 %vm307_vm1, %v1797_v22 }
  0xe1   : > { %v4894_v44 = vpop.f32.mrf.mxu1  ;;  %3326 = vperm.xlu0 %4251, %v3168_v53   ;;  %v1787_v53 = vld [vmem:[%s4411_s11 + $0x114] sm:$0xff] }
  0xe2   : > { %v4898_v49 = vpop.f32.mrf.mxu0 }
  0xe3   : > { %v4900_v51 = vpop.f32.mrf.mxu1 }
  0xe4   : > { %v4908_v54 = vpop.f32.mrf.mxu0 }
  0xe5   : > { %v4910_v57 = vpop.f32.mrf.mxu1  ;;  %3336 = vperm.xlu0 %4251, %v3170_v50  }
  0xe6   : > { %v4912_v20 = vpop.f32.mrf.mxu0  ;;  %4095 = vmatmul.mubr.msk.bf16.gmra.mxu0 %vm307_vm1, %v1797_v22  ;;  %v1805_v22 = vpack.c.bf16 %v1784_v25, %v1783_v19 }
  0xe7   : > { %v4915_v61 = vpop.f32.mrf.mxu1  ;;  %4061 = vmatmul.mubr.msk.bf16.gmra.mxu1 %vm307_vm1, %v1798_v52  ;;  %4098 = vmatprep.mubr.msk.bf16.mxu0 %vm307_vm1, %v1798_v52  ;;  %v1786_v52 = vld [vmem:[%s4411_s11 + $0x10c] sm:$0xff] }
  0xe8   : > { %v4925_v62 = vpop.f32.mrf.mxu0  ;;  %4064 = vmatprep.mubr.msk.bf16.mxu1 %vm307_vm1, %v1799_v56  ;;  %v1806_v24 = vpack.c.bf16 %v1786_v52, %v1785_v38 }
  0xe9   : > { %v4930_v0 = vpop.f32.mrf.mxu1  ;;  %3346 = vperm.xlu0 %4251, %v3172_v5  }
  0xea   : > { %v4934_v2 = vpop.f32.mrf.mxu0 }
  0xeb   : > { %v4936_v26 = vpop.f32.mrf.mxu1 }
  0xec   : > { %v4944_v36 = vpop.f32.mrf.mxu0 }
  0xed   : > { %v4946_v7 = vpop.f32.mrf.mxu1 }
  0xee   : > { %v4948_v9 = vpop.f32.mrf.mxu0  ;;  %4099 = vmatmul.mubr.msk.bf16.gmra.mxu0 %vm307_vm1, %v1799_v56  ;;  %v1788_v56 = vld [vmem:[%s4411_s11 + $0x11c] sm:$0xff] }
  0xef   : > { %v4951_v10 = vpop.f32.mrf.mxu1  ;;  %4065 = vmatmul.mubr.msk.bf16.gmra.mxu1 %vm307_vm1, %v1800_v3  ;;  %4102 = vmatprep.mubr.msk.bf16.mxu0 %vm307_vm1, %v1800_v3  ;;  %v1807_v55 = vpack.c.bf16 %v1788_v56, %v1787_v53  ;;  %v2116_v53 = vld [vmem:[%s4411_s11 + $0x13c] sm:$0xff] }
  0xf0   : > { %v4958_v48 = vpop.f32.mrf.mxu0  ;;  %4068 = vmatprep.mubr.msk.bf16.mxu1 %vm307_vm1, %v1801_v46  ;;  %v2409_v56 = vld [vmem:[%s4411_s11 + $0x35] sm:$0xff] }
  0xf1   : > { %v4963_v14 = vpop.f32.mrf.mxu1 }
  0xf2   : > { %v4967_v60 = vpop.f32.mrf.mxu0 }
  0xf3   : > { %v4969_v59 = vpop.f32.mrf.mxu1 }
  0xf4   : > { %v4971_v18 = vpop.f32.mrf.mxu0 }
  0xf5   : > { %v4973_v21 = vpop.f32.mrf.mxu1 }
  0xf6   : > { %v4975_v23 = vpop.f32.mrf.mxu0  ;;  %4103 = vmatmul.mubr.msk.bf16.gmra.mxu0 %vm307_vm1, %v1801_v46 }
  0xf7   : > { %v4978_v8 = vpop.f32.mrf.mxu1  ;;  %4069 = vmatmul.mubr.msk.bf16.gmra.mxu1 %vm307_vm1, %v1802_v17  ;;  %4106 = vmatprep.mubr.msk.bf16.mxu0 %vm307_vm1, %v1802_v17  ;;  %v2408_v17 = vld [vmem:[%s4411_s11 + $0x2d] sm:$0xff] }
  0xf8   : > { %v4982_v27 = vpop.f32.mrf.mxu0  ;;  %4072 = vmatprep.mubr.msk.bf16.mxu1 %vm307_vm1, %v1803_v6 }
  0xf9   : > { %v4987_v1 = vpop.f32.mrf.mxu1 }
  0xfa   : > { %v4991_v30 = vpop.f32.mrf.mxu0 }
  0xfb   : > { %v4993_v31 = vpop.f32.mrf.mxu1 }
  0xfc   : > { %v4995_v33 = vpop.f32.mrf.mxu0 }
  0xfd   : > { %v4997_v40 = vpop.f32.mrf.mxu1 }
  0xfe   : > { %v4999_v35 = vpop.f32.mrf.mxu0  ;;  %4107 = vmatmul.mubr.msk.bf16.gmra.mxu0 %vm307_vm1, %v1803_v6 }
  0xff   : > { %v3898_v42 = vpop.f32.mrf.mxu1  ;;  %4073 = vmatmul.mubr.msk.bf16.gmra.mxu1 %vm307_vm1, %v1804_v32  ;;  %4110 = vmatprep.mubr.msk.bf16.mxu0 %vm307_vm1, %v1804_v32 }
 0x100   : > { %v643_v43 = vadd.f32 %v3898_v42, %v4876_v37  ;;  %v5005_v45 = vpop.f32.mrf.mxu0  ;;  %4076 = vmatprep.mubr.msk.bf16.mxu1 %vm307_vm1, %v1805_v22 }
 0x101   : > { %v634_v47 = vpop.f32.mrf.mxu1 }
 0x102   : > { %v635_v11 = vadd.f32 %v634_v47, %v4889_v41  ;;  %v5013_v50 = vpop.f32.mrf.mxu0 }
 0x103   : > { %v3899_v63 = vpop.f32.mrf.mxu1 }
 0x104   : > { %v646_v34 = vadd.f32 %v3899_v63, %v4898_v49  ;;  %v5016_v37 = vpop.f32.mrf.mxu0 }
 0x105   : > { %v637_v3 = vpop.f32.mrf.mxu1 }
 0x106   : > { %v638_v4 = vadd.f32 %v637_v3, %v4908_v54  ;;  %v3936_v5 = vpop.f32.mrf.mxu0  ;;  %4111 = vmatmul.mubr.msk.bf16.gmra.mxu0 %vm307_vm1, %v1805_v22  ;;  %v2407_v54 = vld [vmem:[%s4411_s11 + $0x25] sm:$0xff] }
 0x107   : > { %v3902_v41 = vpop.f32.mrf.mxu1  ;;  %v5020_v46 = vadd.f32 %v3936_v5, %v643_v43  ;;  %4077 = vmatmul.mubr.msk.bf16.gmra.mxu1 %vm307_vm1, %v1806_v24  ;;  %4114 = vmatprep.mubr.msk.bf16.mxu0 %vm307_vm1, %v1806_v24  ;;  %v2443_v22 = vpack.c.bf16 %v2408_v17, %v2407_v54  ;;  %v2733_v24 = vld [vmem:[%s4411_s11 + $0x26] sm:$0xff] }
 0x108   : > { %v659_v49 = vadd.f32 %v3902_v41, %v4912_v20  ;;  %v924_v12 = vpop.f32.mrf.mxu0  ;;  %4080 = vmatprep.mubr.msk.bf16.mxu1 %vm307_vm1, %v1807_v55  ;;  %v1808_v20 = vpack.c.bf16 %v1790_v58, %v1789_v13  ;;  %v2412_v5 = vld [vmem:[%s4411_s11 + $0x4d] sm:$0xff] }
 0x109   : > { %v650_v15 = vpop.f32.mrf.mxu1  ;;  %v5028_v16 = vadd.f32 %v924_v12, %v635_v11 }
 0x10a   : > { %v651_v6 = vadd.f32 %v650_v15, %v4925_v62  ;;  %v3937_v28 = vpop.f32.mrf.mxu0 }
 0x10b   : > { %v3903_v29 = vpop.f32.mrf.mxu1  ;;  %v5033_v19 = vadd.f32 %v3937_v28, %v646_v34  ;;  %v2734_v34 = vld [vmem:[%s4411_s11 + $0x2e] sm:$0xff] }
 0x10c   : > { %v662_v25 = vadd.f32 %v3903_v29, %v4934_v2  ;;  %v927_v32 = vpop.f32.mrf.mxu0  ;;  %v2115_v2 = vld [vmem:[%s4411_s11 + $0x134] sm:$0xff]  ;;  %v2769_v15 = vpack.c.bf16 %v2734_v34, %v2733_v24 }
 0x10d   : > { %v653_v42 = vpop.f32.mrf.mxu1  ;;  %v5036_v43 = vadd.f32 %v927_v32, %v638_v4  ;;  %v2411_v4 = vld [vmem:[%s4411_s11 + $0x45] sm:$0xff]  ;;  %v2134_v12 = vpack.c.bf16 %v2116_v53, %v2115_v2  ;;  %v2738_v2 = vld [vmem:[%s4411_s11 + $0x4e] sm:$0xff] }
 0x10e   : > { %v654_v62 = vadd.f32 %v653_v42, %v4944_v36  ;;  %v3940_v38 = vpop.f32.mrf.mxu0  ;;  %4115 = vmatmul.mubr.msk.bf16.gmra.mxu0 %vm307_vm1, %v1807_v55  ;;  %v2410_v36 = vld [vmem:[%s4411_s11 + $0x3d] sm:$0xff]  ;;  %v2445_v28 = vpack.c.bf16 %v2412_v5, %v2411_v4 }
 0x10f   : > { %v3906_v52 = vpop.f32.mrf.mxu1  ;;  %v5040_v47 = vadd.f32 %v3940_v38, %v659_v49  ;;  %4081 = vmatmul.mubr.msk.bf16.gmra.mxu1 %vm307_vm1, %v1808_v20  ;;  %4118 = vmatprep.mubr.msk.bf16.mxu0 %vm307_vm1, %v1808_v20  ;;  %v2736_v42 = vld [vmem:[%s4411_s11 + $0x3e] sm:$0xff] }
 0x110   : > { %v675_v11 = vadd.f32 %v3906_v52, %v4948_v9  ;;  %v940_v63 = vpop.f32.mrf.mxu0  ;;  %4124 = vmatprep.mubr.msk.bf16.mxu1 %vm307_vm1, %v2443_v22  ;;  %v2444_v9 = vpack.c.bf16 %v2410_v36, %v2409_v56  ;;  %v2735_v22 = vld [vmem:[%s4411_s11 + $0x36] sm:$0xff]  ;;  %v2737_v52 = vld [vmem:[%s4411_s11 + $0x46] sm:$0xff] }
 0x111   : > { %v666_v55 = vpop.f32.mrf.mxu1  ;;  %v5052_v3 = vadd.f32 %v940_v63, %v651_v6  ;;  %v2416_v63 = vld [vmem:[%s4411_s11 + $0x6d] sm:$0xff]  ;;  %v2770_v34 = vpack.c.bf16 %v2736_v42, %v2735_v22  ;;  %v2771_v5 = vpack.c.bf16 %v2738_v2, %v2737_v52 }
 0x112   : > { %v667_v41 = vadd.f32 %v666_v55, %v4958_v48  ;;  %v3941_v49 = vpop.f32.mrf.mxu0 }
 0x113   : > { %v3907_v13 = vpop.f32.mrf.mxu1  ;;  %v5057_v58 = vadd.f32 %v3941_v49, %v662_v25 }
 0x114   : > { %v678_v54 = vadd.f32 %v3907_v13, %v4967_v60  ;;  %v943_v17 = vpop.f32.mrf.mxu0  ;;  %v2413_v60 = vld [vmem:[%s4411_s11 + $0x55] sm:$0xff] }
 0x115   : > { %v669_v6 = vpop.f32.mrf.mxu1  ;;  %v5060_v29 = vadd.f32 %v943_v17, %v654_v62 }
 0x116   : > { %v670_v48 = vadd.f32 %v669_v6, %v4971_v18  ;;  %v3944_v20 = vpop.f32.mrf.mxu0  ;;  %4119 = vmatmul.mubr.msk.bf16.gmra.mxu0 %vm307_vm1, %v2134_v12  ;;  %v2414_v18 = vld [vmem:[%s4411_s11 + $0x5d] sm:$0xff] }
 0x117   : > { %v3910_v25 = vpop.f32.mrf.mxu1  ;;  %v5064_v32 = vadd.f32 %v3944_v20, %v675_v11  ;;  %4125 = vmatmul.mubr.msk.bf16.vlgmr.msra.gmra.mxu1 %vm307_vm1, %v2444_v9  ;;  %4162 = vmatprep.mubr.msk.bf16.mxu0 %vm307_vm1, %v2769_v15  ;;  %v2415_v11 = vld [vmem:[%s4411_s11 + $0x65] sm:$0xff] }
 0x118   : > { %v691_v62 = vadd.f32 %v3910_v25, %v4975_v23  ;;  %v956_v38 = vpop.f32.mrf.mxu0  ;;  %4128 = vmatprep.mubr.msk.bf16.mxu1 %vm307_vm1, %v2445_v28  ;;  %v2446_v23 = vpack.c.bf16 %v2414_v18, %v2413_v60  ;;  %v2447_v13 = vpack.c.bf16 %v2416_v63, %v2415_v11  ;;  %v2739_v28 = vld [vmem:[%s4411_s11 + $0x56] sm:$0xff]  ;;  %v2740_v6 = vld [vmem:[%s4411_s11 + $0x5e] sm:$0xff]  ;;  %v2741_v25 = vld [vmem:[%s4411_s11 + $0x66] sm:$0xff] }
 0x119   : > { %v682_v53 = vpop.f32.mrf.mxu1  ;;  %v5076_v56 = vadd.f32 %v956_v38, %v667_v41  ;;  %v2742_v60 = vld [vmem:[%s4411_s11 + $0x6e] sm:$0xff]  ;;  %v2772_v2 = vpack.c.bf16 %v2740_v6, %v2739_v28  ;;  %v2423_v6 = vld [vmem:[%s4411_s11 + $0xa5] sm:$0xff] }
 0x11a   : > { %v683_v36 = vadd.f32 %v682_v53, %v4982_v27  ;;  %v3945_v24 = vpop.f32.mrf.mxu0  ;;  %v2420_v38 = vld [vmem:[%s4411_s11 + $0x8d] sm:$0xff]  ;;  %v2773_v63 = vpack.c.bf16 %v2742_v60, %v2741_v25 }
 0x11b   : > { %v3911_v55 = vpop.f32.mrf.mxu1  ;;  %v5081_v4 = vadd.f32 %v3945_v24, %v678_v54 }
 0x11c   : > { %v694_v49 = vadd.f32 %v3911_v55, %v4991_v30  ;;  %v959_v12 = vpop.f32.mrf.mxu0  ;;  %v2417_v30 = vld [vmem:[%s4411_s11 + $0x75] sm:$0xff] }
 0x11d   : > { %v685_v41 = vpop.f32.mrf.mxu1  ;;  %v5084_v9 = vadd.f32 %v959_v12, %v670_v48 }
 0x11e   : > { %v686_v27 = vadd.f32 %v685_v41, %v4995_v33  ;;  %v3948_v15 = vpop.f32.mrf.mxu0  ;;  %4163 = vmatmul.mubr.msk.bf16.vlgmr.msra.gmra.mxu0 %vm307_vm1, %v2770_v34  ;;  %v2418_v33 = vld [vmem:[%s4411_s11 + $0x7d] sm:$0xff] }
 0x11f   : > { %v3914_v54 = vpop.f32.mrf.mxu1  ;;  %v5088_v17 = vadd.f32 %v3948_v15, %v691_v62  ;;  %4129 = vmatmul.mubr.msk.bf16.gmra.mxu1 %vm307_vm1, %v2446_v23  ;;  %4166 = vmatprep.mubr.msk.bf16.mxu0 %vm307_vm1, %v2771_v5  ;;  %v2419_v62 = vld [vmem:[%s4411_s11 + $0x85] sm:$0xff] }
 0x120   : > { %v707_v48 = vadd.f32 %v3914_v54, %v4999_v35  ;;  %v972_v20 = vpop.f32.mrf.mxu0  ;;  %4132 = vmatprep.mubr.msk.bf16.mxu1 %vm307_vm1, %v2447_v13  ;;  %v2448_v35 = vpack.c.bf16 %v2418_v33, %v2417_v30  ;;  %v2743_v13 = vld [vmem:[%s4411_s11 + $0x76] sm:$0xff]  ;;  %v2744_v41 = vld [vmem:[%s4411_s11 + $0x7e] sm:$0xff]  ;;  %v2746_v54 = vld [vmem:[%s4411_s11 + $0x8e] sm:$0xff] }
 0x121   : > { %v698_v22 = vpop.f32.mrf.mxu1  ;;  %v5100_v42 = vadd.f32 %v972_v20, %v683_v36  ;;  %v2449_v36 = vpack.c.bf16 %v2420_v38, %v2419_v62  ;;  %v2424_v20 = vld [vmem:[%s4411_s11 + $0xad] sm:$0xff]  ;;  %v2774_v33 = vpack.c.bf16 %v2744_v41, %v2743_v13 }
 0x122   : > { %v699_v18 = vadd.f32 %v698_v22, %v5005_v45  ;;  %v3949_v52 = vpop.f32.mrf.mxu0 }
 0x123   : > { %v3915_v53 = vpop.f32.mrf.mxu1  ;;  %v5105_v11 = vadd.f32 %v3949_v52, %v694_v49  ;;  %v2451_v52 = vpack.c.bf16 %v2424_v20, %v2423_v6 }
 0x124   : > { %v710_v24 = vadd.f32 %v3915_v53, %v5013_v50  ;;  %v975_v34 = vpop.f32.mrf.mxu0  ;;  %v2421_v50 = vld [vmem:[%s4411_s11 + $0x95] sm:$0xff] }
 0x125   : > { %v701_v55 = vpop.f32.mrf.mxu1  ;;  %v5108_v23 = vadd.f32 %v975_v34, %v686_v27  ;;  %v2422_v27 = vld [vmem:[%s4411_s11 + $0x9d] sm:$0xff] }
 0x126   : > { %v702_v45 = vadd.f32 %v701_v55, %v5016_v37  ;;  %v3952_v5 = vpop.f32.mrf.mxu0  ;;  %4167 = vmatmul.mubr.msk.bf16.gmra.mxu0 %vm307_vm1, %v2772_v2  ;;  %v2745_v37 = vld [vmem:[%s4411_s11 + $0x86] sm:$0xff]  ;;  %v2450_v22 = vpack.c.bf16 %v2422_v27, %v2421_v50  ;;  %v2748_v55 = vld [vmem:[%s4411_s11 + $0x9e] sm:$0xff]  ;;  %v2750_v50 = vld [vmem:[%s4411_s11 + $0xae] sm:$0xff] }
 0x127   : > { %v3918_v49 = vpop.f32.mrf.mxu1  ;;  %v5112_v12 = vadd.f32 %v3952_v5, %v707_v48  ;;  %4133 = vmatmul.mubr.msk.bf16.gmra.mxu1 %vm307_vm1, %v2448_v35  ;;  %4170 = vmatprep.mubr.msk.bf16.mxu0 %vm307_vm1, %v2773_v63  ;;  %v2775_v62 = vpack.c.bf16 %v2746_v54, %v2745_v37  ;;  %v2428_v27 = vld [vmem:[%s4411_s11 + $0xcd] sm:$0xff] }
 0x128   : > { %v988_v15 = vpop.f32.mrf.mxu0  ;;  %4136 = vmatprep.mubr.msk.bf16.mxu1 %vm307_vm1, %v2449_v36  ;;  %v723_v2 = vadd.f32 %v3918_v49, %v4879_v39  ;;  %v2425_v39 = vld [vmem:[%s4411_s11 + $0xb5] sm:$0xff]  ;;  %v2749_v49 = vld [vmem:[%s4411_s11 + $0xa6] sm:$0xff] }
 0x129   : > { %v714_v30 = vpop.f32.mrf.mxu1  ;;  %v5123_v28 = vadd.f32 %v988_v15, %v699_v18  ;;  %v2747_v36 = vld [vmem:[%s4411_s11 + $0x96] sm:$0xff]  ;;  %v2427_v15 = vld [vmem:[%s4411_s11 + $0xc5] sm:$0xff] }
 0x12a   : > { %v3953_v48 = vpop.f32.mrf.mxu0  ;;  %v715_v63 = vadd.f32 %v714_v30, %v4894_v44  ;;  %v2776_v54 = vpack.c.bf16 %v2748_v55, %v2747_v36  ;;  %v2753_v36 = vld [vmem:[%s4411_s11 + $0xc6] sm:$0xff]  ;;  %v2754_v55 = vld [vmem:[%s4411_s11 + $0xce] sm:$0xff] }
 0x12b   : > { %v3919_v25 = vpop.f32.mrf.mxu1  ;;  %v5127_v60 = vadd.f32 %v3953_v48, %v710_v24 }
 0x12c   : > { %v991_v38 = vpop.f32.mrf.mxu0  ;;  %v726_v44 = vadd.f32 %v3919_v25, %v4900_v51 }
 0x12d   : > { %v717_v18 = vpop.f32.mrf.mxu1  ;;  %v5130_v53 = vadd.f32 %v991_v38, %v702_v45  ;;  %v2426_v45 = vld [vmem:[%s4411_s11 + $0xbd] sm:$0xff] }
 0x12e   : > { %v3956_v35 = vpop.f32.mrf.mxu0  ;;  %4171 = vmatmul.mubr.msk.bf16.gmra.mxu0 %vm307_vm1, %v2774_v33  ;;  %v718_v30 = vadd.f32 %v717_v18, %v4910_v57  ;;  %v2452_v48 = vpack.c.bf16 %v2426_v45, %v2425_v39  ;;  %v2777_v33 = vpack.c.bf16 %v2750_v50, %v2749_v49  ;;  %v2430_v39 = vld [vmem:[%s4411_s11 + $0xdd] sm:$0xff]  ;;  %v2431_v49 = vld [vmem:[%s4411_s11 + $0xe5] sm:$0xff]  ;;  %v2432_v50 = vld [vmem:[%s4411_s11 + $0xed] sm:$0xff] }
 0x12f   : > { %v3922_v24 = vpop.f32.mrf.mxu1  ;;  %v5134_v34 = vadd.f32 %v3956_v35, %v723_v2  ;;  %4137 = vmatmul.mubr.msk.bf16.gmra.mxu1 %vm307_vm1, %v2450_v22  ;;  %4174 = vmatprep.mubr.msk.bf16.mxu0 %vm307_vm1, %v2775_v62  ;;  %v2453_v62 = vpack.c.bf16 %v2428_v27, %v2427_v15  ;;  %v2751_v35 = vld [vmem:[%s4411_s11 + $0xb6] sm:$0xff] }
 0x130   : > { %v1004_v5 = vpop.f32.mrf.mxu0  ;;  %4140 = vmatprep.mubr.msk.bf16.mxu1 %vm307_vm1, %v2451_v52  ;;  %v739_v51 = vadd.f32 %v3922_v24, %v4915_v61  ;;  %v2429_v61 = vld [vmem:[%s4411_s11 + $0xd5] sm:$0xff] }
 0x131   : > { %v730_v13 = vpop.f32.mrf.mxu1  ;;  %v5146_v41 = vadd.f32 %v1004_v5, %v715_v63  ;;  %v2752_v63 = vld [vmem:[%s4411_s11 + $0xbe] sm:$0xff] }
 0x132   : > { %v3957_v37 = vpop.f32.mrf.mxu0  ;;  %v731_v57 = vadd.f32 %v730_v13, %v4930_v0  ;;  %v2778_v13 = vpack.c.bf16 %v2752_v63, %v2751_v35  ;;  %v2757_v35 = vld [vmem:[%s4411_s11 + $0xe6] sm:$0xff]  ;;  %v2758_v63 = vld [vmem:[%s4411_s11 + $0xee] sm:$0xff] }
 0x133   : > { %v3923_v6 = vpop.f32.mrf.mxu1  ;;  %v5151_v20 = vadd.f32 %v3957_v37, %v726_v44 }
 0x134   : > { %v1007_v22 = vpop.f32.mrf.mxu0  ;;  %v742_v0 = vadd.f32 %v3923_v6, %v4936_v26 }
 0x135   : > { %v733_v25 = vpop.f32.mrf.mxu1  ;;  %v5154_v38 = vadd.f32 %v1007_v22, %v718_v30  ;;  %v2779_v30 = vpack.c.bf16 %v2754_v55, %v2753_v36  ;;  %v2435_v36 = vld [vmem:[%s4411_s11 + $0x105] sm:$0xff]  ;;  %v2436_v55 = vld [vmem:[%s4411_s11 + $0x10d] sm:$0xff] }
 0x136   : > { %v3960_v52 = vpop.f32.mrf.mxu0  ;;  %4175 = vmatmul.mubr.msk.bf16.gmra.mxu0 %vm307_vm1, %v2776_v54  ;;  %v734_v15 = vadd.f32 %v733_v25, %v4946_v7  ;;  %v2454_v54 = vpack.c.bf16 %v2430_v39, %v2429_v61  ;;  %v2434_v61 = vld [vmem:[%s4411_s11 + $0xfd] sm:$0xff] }
 0x137   : > { %v3926_v2 = vpop.f32.mrf.mxu1  ;;  %v5158_v18 = vadd.f32 %v3960_v52, %v739_v51  ;;  %4141 = vmatmul.mubr.msk.bf16.gmra.mxu1 %vm307_vm1, %v2452_v48  ;;  %4178 = vmatprep.mubr.msk.bf16.mxu0 %vm307_vm1, %v2777_v33  ;;  %v2455_v33 = vpack.c.bf16 %v2432_v50, %v2431_v49  ;;  %v2755_v52 = vld [vmem:[%s4411_s11 + $0xd6] sm:$0xff] }
 0x138   : > { %v1020_v24 = vpop.f32.mrf.mxu0  ;;  %4144 = vmatprep.mubr.msk.bf16.mxu1 %vm307_vm1, %v2453_v62  ;;  %v755_v26 = vadd.f32 %v3926_v2, %v4951_v10  ;;  %v2433_v10 = vld [vmem:[%s4411_s11 + $0xf5] sm:$0xff] }
 0x139   : > { %v746_v5 = vpop.f32.mrf.mxu1  ;;  %v5170_v45 = vadd.f32 %v1020_v24, %v731_v57  ;;  %v2756_v57 = vld [vmem:[%s4411_s11 + $0xde] sm:$0xff] }
 0x13a   : > { %v3961_v44 = vpop.f32.mrf.mxu0  ;;  %v747_v7 = vadd.f32 %v746_v5, %v4963_v14  ;;  %v2780_v5 = vpack.c.bf16 %v2756_v57, %v2755_v52  ;;  %v2438_v52 = vld [vmem:[%s4411_s11 + $0x11d] sm:$0xff]  ;;  %v2761_v57 = vld [vmem:[%s4411_s11 + $0x106] sm:$0xff] }
 0x13b   : > { %v3927_v27 = vpop.f32.mrf.mxu1  ;;  %v5175_v37 = vadd.f32 %v3961_v44, %v742_v0 }
 0x13c   : > { %v1023_v48 = vpop.f32.mrf.mxu0  ;;  %v758_v14 = vadd.f32 %v3927_v27, %v4969_v59 }
 0x13d   : > { %v749_v6 = vpop.f32.mrf.mxu1  ;;  %v5178_v22 = vadd.f32 %v1023_v48, %v734_v15  ;;  %v2781_v15 = vpack.c.bf16 %v2758_v63, %v2757_v35  ;;  %v2439_v63 = vld [vmem:[%s4411_s11 + $0x125] sm:$0xff] }
 0x13e   : > { %v3964_v62 = vpop.f32.mrf.mxu0  ;;  %4179 = vmatmul.mubr.msk.bf16.gmra.mxu0 %vm307_vm1, %v2778_v13  ;;  %v750_v49 = vadd.f32 %v749_v6, %v4973_v21  ;;  %v2456_v13 = vpack.c.bf16 %v2434_v61, %v2433_v10 }
 0x13f   : > { %v3930_v51 = vpop.f32.mrf.mxu1  ;;  %v5182_v25 = vadd.f32 %v3964_v62, %v755_v26  ;;  %4145 = vmatmul.mubr.msk.bf16.gmra.mxu1 %vm307_vm1, %v2454_v54  ;;  %4182 = vmatprep.mubr.msk.bf16.mxu0 %vm307_vm1, %v2779_v30  ;;  %v2457_v30 = vpack.c.bf16 %v2436_v55, %v2435_v36  ;;  %v2759_v62 = vld [vmem:[%s4411_s11 + $0xf6] sm:$0xff] }
 0x140   : > { %v1036_v2 = vpop.f32.mrf.mxu0  ;;  %4148 = vmatprep.mubr.msk.bf16.mxu1 %vm307_vm1, %v2455_v33  ;;  %v771_v59 = vadd.f32 %v3930_v51, %v4978_v8  ;;  %v2437_v8 = vld [vmem:[%s4411_s11 + $0x115] sm:$0xff] }
 0x141   : > { %v762_v24 = vpop.f32.mrf.mxu1  ;;  %v5194_v39 = vadd.f32 %v1036_v2, %v747_v7  ;;  %v2760_v7 = vld [vmem:[%s4411_s11 + $0xfe] sm:$0xff] }
 0x142   : > { %v3965_v0 = vpop.f32.mrf.mxu0  ;;  %v763_v21 = vadd.f32 %v762_v24, %v4987_v1  ;;  %v2762_v1 = vld [vmem:[%s4411_s11 + $0x10e] sm:$0xff]  ;;  %v2782_v55 = vpack.c.bf16 %v2760_v7, %v2759_v62  ;;  %v2442_v62 = vld [vmem:[%s4411_s11 + $0x13d] sm:$0xff] }
 0x143   : > { %v3931_v50 = vpop.f32.mrf.mxu1  ;;  %v5199_v44 = vadd.f32 %v3965_v0, %v758_v14  ;;  %v2440_v14 = vld [vmem:[%s4411_s11 + $0x12d] sm:$0xff] }
 0x144   : > { %v1039_v54 = vpop.f32.mrf.mxu0  ;;  %v774_v2 = vadd.f32 %v3931_v50, %v4993_v31  ;;  %v2766_v7 = vld [vmem:[%s4411_s11 + $0x12e] sm:$0xff] }
 0x145   : > { %v765_v27 = vpop.f32.mrf.mxu1  ;;  %v5202_v48 = vadd.f32 %v1039_v54, %v750_v49  ;;  %v2458_v49 = vpack.c.bf16 %v2438_v52, %v2437_v8 }
 0x146   : > { %v3968_v33 = vpop.f32.mrf.mxu0  ;;  %4183 = vmatmul.mubr.msk.bf16.gmra.mxu0 %vm307_vm1, %v2780_v5  ;;  %v766_v0 = vadd.f32 %v765_v27, %v4997_v40 }
 0x147   : > { %v5206_v26 = vadd.f32 %v3968_v33, %v771_v59  ;;  %v3974_v6 = vpop.f32.mrf.mxu1  ;;  %4149 = vmatmul.mubr.msk.bf16.gmra.mxu1 %vm307_vm1, %v2456_v13  ;;  %4186 = vmatprep.mubr.msk.bf16.mxu0 %vm307_vm1, %v2781_v15  ;;  %v2783_v13 = vpack.c.bf16 %v2762_v1, %v2761_v57  ;;  %v2459_v15 = vpack.c.bf16 %v2440_v14, %v2439_v63  ;;  %v2763_v33 = vld [vmem:[%s4411_s11 + $0x116] sm:$0xff] }
 0x148   : > { %v1395_v51 = vadd.f32 %v3974_v6, %v5020_v46  ;;  %v1052_v10 = vpop.f32.mrf.mxu0  ;;  %4152 = vmatprep.mubr.msk.bf16.mxu1 %vm307_vm1, %v2457_v30 }
 0x149   : > { %v5219_v61 = vadd.f32 %v1052_v10, %v763_v21  ;;  %v1250_v35 = vpop.f32.mrf.mxu1  ;;  %v2764_v21 = vld [vmem:[%s4411_s11 + $0x11e] sm:$0xff] }
 0x14a   : > { %v1393_v24 = vadd.f32 %v1250_v35, %v5028_v16  ;;  %v3969_v36 = vpop.f32.mrf.mxu0  ;;  %v2784_v1 = vpack.c.bf16 %v2764_v21, %v2763_v33 }
 0x14b   : > { %v5225_v46 = vadd.f32 %v3969_v36, %v774_v2  ;;  %v3975_v5 = vpop.f32.mrf.mxu1 }
 0x14c   : > { %v1396_v31 = vadd.f32 %v3975_v5, %v5033_v19  ;;  %v1055_v50 = vpop.f32.mrf.mxu0  ;;  %v2441_v19 = vld [vmem:[%s4411_s11 + $0x135] sm:$0xff] }
 0x14d   : > { %v5228_v54 = vadd.f32 %v1055_v50, %v766_v0  ;;  %v1253_v16 = vpop.f32.mrf.mxu1  ;;  %v2460_v63 = vpack.c.bf16 %v2442_v62, %v2441_v19 }
 0x14e   : > { %v1394_v40 = vadd.f32 %v1253_v16, %v5036_v43  ;;  %v4012_v30 = vpop.f32.mrf.mxu0  ;;  %4187 = vmatmul.mubr.msk.bf16.gmra.mxu0 %vm307_vm1, %v2782_v55  ;;  %v2765_v43 = vld [vmem:[%s4411_s11 + $0x126] sm:$0xff] }
 0x14f   : > { %v3978_v59 = vpop.f32.mrf.mxu1  ;;  %v5232_v27 = vadd.f32 %v4012_v30, %v1395_v51  ;;  %4153 = vmatmul.mubr.msk.bf16.gmra.mxu1 %vm307_vm1, %v2458_v49  ;;  %4190 = vmatprep.mubr.msk.bf16.mxu0 %vm307_vm1, %v2783_v13  ;;  %v2767_v13 = vld [vmem:[%s4411_s11 + $0x136] sm:$0xff] }
 0x150   : > { %v1399_v6 = vadd.f32 %v3978_v59, %v5040_v47  ;;  %v1576_v8 = vpop.f32.mrf.mxu0  ;;  %4156 = vmatprep.mubr.msk.bf16.mxu1 %vm307_vm1, %v2459_v15  ;;  %v2785_v47 = vpack.c.bf16 %v2766_v7, %v2765_v43 }
 0x151   : > { %v1266_v10 = vpop.f32.mrf.mxu1  ;;  %v5244_v52 = vadd.f32 %v1576_v8, %v1393_v24 }
 0x152   : > { %v1397_v51 = vadd.f32 %v1266_v10, %v5052_v3  ;;  %v4013_v57 = vpop.f32.mrf.mxu0 }
 0x153   : > { %v3979_v2 = vpop.f32.mrf.mxu1  ;;  %v5247_v35 = vadd.f32 %v4013_v57, %v1396_v31  ;;  %v2768_v31 = vld [vmem:[%s4411_s11 + $0x13e] sm:$0xff] }
 0x154   : > { %v1400_v14 = vadd.f32 %v3979_v2, %v5057_v58  ;;  %v1579_v36 = vpop.f32.mrf.mxu0  ;;  %v2786_v30 = vpack.c.bf16 %v2768_v31, %v2767_v13 }
 0x155   : > { %v1269_v55 = vpop.f32.mrf.mxu1  ;;  %v5250_v0 = vadd.f32 %v1579_v36, %v1394_v40 }
 0x156   : > { %v1398_v24 = vadd.f32 %v1269_v55, %v5060_v29  ;;  %v4016_v5 = vpop.f32.mrf.mxu0  ;;  %4191 = vmatmul.mubr.msk.bf16.gmra.mxu0 %vm307_vm1, %v2784_v1 }
 0x157   : > { %v3982_v3 = vpop.f32.mrf.mxu1  ;;  %v5254_v49 = vadd.f32 %v4016_v5, %v1399_v6  ;;  %4157 = vmatmul.mubr.msk.bf16.gmra.mxu1 %vm307_vm1, %v2460_v63  ;;  %4194 = vmatprep.mubr.msk.bf16.mxu0 %vm307_vm1, %v2785_v47 }
 0x158   : > { %v1403_v58 = vadd.f32 %v3982_v3, %v5064_v32  ;;  %v1592_v50 = vpop.f32.mrf.mxu0 }
 0x159   : > { %v1282_v15 = vpop.f32.mrf.mxu1  ;;  %v5261_v16 = vadd.f32 %v1592_v50, %v1397_v51 }
 0x15a   : > { %v1401_v29 = vadd.f32 %v1282_v15, %v5076_v56  ;;  %v4017_v40 = vpop.f32.mrf.mxu0 }
 0x15b   : > { %v3983_v59 = vpop.f32.mrf.mxu1  ;;  %v5264_v19 = vadd.f32 %v4017_v40, %v1400_v14 }
 0x15c   : > { %v1404_v33 = vadd.f32 %v3983_v59, %v5081_v4  ;;  %v1595_v21 = vpop.f32.mrf.mxu0 }
 0x15d   : > { %v1285_v6 = vpop.f32.mrf.mxu1  ;;  %v5267_v8 = vadd.f32 %v1595_v21, %v1398_v24 }
 0x15e   : > { %v1402_v62 = vadd.f32 %v1285_v6, %v5084_v9  ;;  %v4020_v32 = vpop.f32.mrf.mxu0  ;;  %4195 = vmatmul.mubr.msk.bf16.gmra.mxu0 %vm307_vm1, %v2786_v30 }
 0x15f   : > { %v3986_v43 = vpop.f32.mrf.mxu1  ;;  %v5271_v7 = vadd.f32 %v4020_v32, %v1403_v58 }
 0x160   : > { %v1407_v56 = vadd.f32 %v3986_v43, %v5088_v17  ;;  %v1608_v10 = vpop.f32.mrf.mxu0 }
 0x161   : > { %v1298_v51 = vpop.f32.mrf.mxu1  ;;  %v5274_v57 = vadd.f32 %v1608_v10, %v1401_v29 }
 0x162   : > { %v1405_v4 = vadd.f32 %v1298_v51, %v5100_v42  ;;  %v4021_v1 = vpop.f32.mrf.mxu0 }
 0x163   : > { %v3987_v2 = vpop.f32.mrf.mxu1  ;;  %v5277_v63 = vadd.f32 %v4021_v1, %v1404_v33 }
 0x164   : > { %v1408_v9 = vadd.f32 %v3987_v2, %v5105_v11  ;;  %v1611_v47 = vpop.f32.mrf.mxu0 }
 0x165   : > { %v1301_v14 = vpop.f32.mrf.mxu1  ;;  %v5280_v36 = vadd.f32 %v1611_v47, %v1402_v62 }
 0x166   : > { %v1406_v55 = vadd.f32 %v1301_v14, %v5108_v23  ;;  %v4024_v24 = vpop.f32.mrf.mxu0 }
 0x167   : > { %v3990_v17 = vpop.f32.mrf.mxu1  ;;  %v5283_v5 = vadd.f32 %v4024_v24, %v1407_v56 }
 0x168   : > { %v1411_v3 = vadd.f32 %v3990_v17, %v5112_v12  ;;  %v1624_v13 = vpop.f32.mrf.mxu0 }
 0x169   : > { %v1314_v42 = vpop.f32.mrf.mxu1  ;;  %v5286_v31 = vadd.f32 %v1624_v13, %v1405_v4 }
 0x16a   : > { %v1409_v58 = vadd.f32 %v1314_v42, %v5123_v28  ;;  %v4025_v50 = vpop.f32.mrf.mxu0 }
 0x16b   : > { %v3991_v11 = vpop.f32.mrf.mxu1  ;;  %v5289_v15 = vadd.f32 %v4025_v50, %v1408_v9 }
 0x16c   : > { %v1412_v29 = vadd.f32 %v3991_v11, %v5127_v60  ;;  %v1627_v40 = vpop.f32.mrf.mxu0 }
 0x16d   : > { %v1317_v23 = vpop.f32.mrf.mxu1  ;;  %v5292_v30 = vadd.f32 %v1627_v40, %v1406_v55 }
 0x16e   : > { %v1410_v59 = vadd.f32 %v1317_v23, %v5130_v53  ;;  %v4028_v33 = vpop.f32.mrf.mxu0 }
 0x16f   : > { %v3994_v12 = vpop.f32.mrf.mxu1  ;;  %v5295_v21 = vadd.f32 %v4028_v33, %v1411_v3 }
 0x170   : > { %v1415_v6 = vadd.f32 %v3994_v12, %v5134_v34  ;;  %v1640_v62 = vpop.f32.mrf.mxu0 }
 0x171   : > { %v1330_v28 = vpop.f32.mrf.mxu1  ;;  %v5298_v32 = vadd.f32 %v1640_v62, %v1409_v58 }
 0x172   : > { %v1413_v43 = vadd.f32 %v1330_v28, %v5146_v41  ;;  %v4029_v56 = vpop.f32.mrf.mxu0 }
 0x173   : > { %v3995_v60 = vpop.f32.mrf.mxu1  ;;  %v5301_v10 = vadd.f32 %v4029_v56, %v1412_v29 }
 0x174   : > { %v1416_v51 = vadd.f32 %v3995_v60, %v5151_v20  ;;  %v1643_v4 = vpop.f32.mrf.mxu0 }
 0x175   : > { %v1333_v53 = vpop.f32.mrf.mxu1  ;;  %v5304_v1 = vadd.f32 %v1643_v4, %v1410_v59 }
 0x176   : > { %v1414_v2 = vadd.f32 %v1333_v53, %v5154_v38  ;;  %v4032_v9 = vpop.f32.mrf.mxu0 }
 0x177   : > { %v3998_v34 = vpop.f32.mrf.mxu1  ;;  %v5307_v47 = vadd.f32 %v4032_v9, %v1415_v6 }
 0x178   : > { %v1419_v14 = vadd.f32 %v3998_v34, %v5158_v18  ;;  %v1656_v55 = vpop.f32.mrf.mxu0 }
 0x179   : > { %v1346_v41 = vpop.f32.mrf.mxu1  ;;  %v5310_v24 = vadd.f32 %v1656_v55, %v1413_v43 }
 0x17a   : > { %v1417_v17 = vadd.f32 %v1346_v41, %v5170_v45  ;;  %v4033_v3 = vpop.f32.mrf.mxu0 }
 0x17b   : > { %v3999_v20 = vpop.f32.mrf.mxu1  ;;  %v5313_v13 = vadd.f32 %v4033_v3, %v1416_v51 }
 0x17c   : > { %v1420_v42 = vadd.f32 %v3999_v20, %v5175_v37  ;;  %v1659_v58 = vpop.f32.mrf.mxu0 }
 0x17d   : > { %v1349_v38 = vpop.f32.mrf.mxu1  ;;  %v5316_v50 = vadd.f32 %v1659_v58, %v1414_v2 }
 0x17e   : > { %v1418_v11 = vadd.f32 %v1349_v38, %v5178_v22  ;;  %v4036_v29 = vpop.f32.mrf.mxu0 }
 0x17f   : > { %v4002_v18 = vpop.f32.mrf.mxu1  ;;  %v5319_v40 = vadd.f32 %v4036_v29, %v1419_v14 }
 0x180   : > { %v1423_v23 = vadd.f32 %v4002_v18, %v5182_v25  ;;  %v1672_v59 = vpop.f32.mrf.mxu0 }
 0x181   : > { %v1362_v45 = vpop.f32.mrf.mxu1  ;;  %v5322_v33 = vadd.f32 %v1672_v59, %v1417_v17 }
 0x182   : > { %v1421_v12 = vadd.f32 %v1362_v45, %v5194_v39  ;;  %v4037_v6 = vpop.f32.mrf.mxu0 }
 0x183   : > { %v4003_v37 = vpop.f32.mrf.mxu1  ;;  %v5325_v62 = vadd.f32 %v4037_v6, %v1420_v42 }
 0x184   : > { %v1424_v28 = vadd.f32 %v4003_v37, %v5199_v44  ;;  %v1675_v43 = vpop.f32.mrf.mxu0 }
 0x185   : > { %v1365_v22 = vpop.f32.mrf.mxu1  ;;  %v5328_v56 = vadd.f32 %v1675_v43, %v1418_v11 }
 0x186   : > { %v1422_v60 = vadd.f32 %v1365_v22, %v5202_v48  ;;  %v4040_v51 = vpop.f32.mrf.mxu0 }
 0x187   : > { %v4006_v25 = vpop.f32.mrf.mxu1  ;;  %v5331_v4 = vadd.f32 %v4040_v51, %v1423_v23 }
 0x188   : > { %v1427_v53 = vadd.f32 %v4006_v25, %v5206_v26  ;;  %v1688_v2 = vpop.f32.mrf.mxu0 }
 0x189   : > { %v1378_v39 = vpop.f32.mrf.mxu1  ;;  %v5334_v9 = vadd.f32 %v1688_v2, %v1421_v12 }
 0x18a   : > { %v1425_v34 = vadd.f32 %v1378_v39, %v5219_v61  ;;  %v4041_v14 = vpop.f32.mrf.mxu0 }
 0x18b   : > { %v4007_v44 = vpop.f32.mrf.mxu1  ;;  %v5337_v55 = vadd.f32 %v4041_v14, %v1424_v28 }
 0x18c   : > { %v1428_v41 = vadd.f32 %v4007_v44, %v5225_v46  ;;  %v1691_v17 = vpop.f32.mrf.mxu0 }
 0x18d   : > { %v1381_v48 = vpop.f32.mrf.mxu1  ;;  %v5340_v3 = vadd.f32 %v1691_v17, %v1422_v60 }
 0x18e   : > { %v1426_v20 = vadd.f32 %v1381_v48, %v5228_v54  ;;  %v4044_v42 = vpop.f32.mrf.mxu0 }
 0x18f   : > { %v5343_v26 = vadd.f32 %v4044_v42, %v1427_v53  ;;  %v4050_v58 = vpop.f32.mrf.mxu1 }
 0x190   : > { %v2047_v38 = vadd.f32 %v4050_v58, %v5232_v27  ;;  %v1704_v11 = vpop.f32.mrf.mxu0 }
 0x191   : > { %v5346_v61 = vadd.f32 %v1704_v11, %v1425_v34  ;;  %v1902_v29 = vpop.f32.mrf.mxu1 }
 0x192   : > { %v2045_v18 = vadd.f32 %v1902_v29, %v5244_v52  ;;  %v4045_v23 = vpop.f32.mrf.mxu0 }
 0x193   : > { %v5349_v46 = vadd.f32 %v4045_v23, %v1428_v41  ;;  %v4051_v59 = vpop.f32.mrf.mxu1 }
 0x194   : > { %v2048_v45 = vadd.f32 %v4051_v59, %v5247_v35  ;;  %v1707_v12 = vpop.f32.mrf.mxu0 }
 0x195   : > { %v5352_v54 = vadd.f32 %v1707_v12, %v1426_v20  ;;  %v1905_v6 = vpop.f32.mrf.mxu1 }
 0x196   : > { %v2046_v37 = vadd.f32 %v1905_v6, %v5250_v0  ;;  %v4088_v28 = vpop.f32.mrf.mxu0 }
 0x197   : > { %v4054_v27 = vpop.f32.mrf.mxu1  ;;  %v5355_v43 = vadd.f32 %v4088_v28, %v2047_v38 }
 0x198   : > { %v2051_v22 = vadd.f32 %v4054_v27, %v5254_v49  ;;  %v2228_v60 = vpop.f32.mrf.mxu0 }
 0x199   : > { %v1918_v52 = vpop.f32.mrf.mxu1  ;;  %v5358_v51 = vadd.f32 %v2228_v60, %v2045_v18 }
 0x19a   : > { %v2049_v25 = vadd.f32 %v1918_v52, %v5261_v16  ;;  %v4089_v53 = vpop.f32.mrf.mxu0 }
 0x19b   : > { %v4055_v35 = vpop.f32.mrf.mxu1  ;;  %v5361_v2 = vadd.f32 %v4089_v53, %v2048_v45 }
 0x19c   : > { %v2052_v39 = vadd.f32 %v4055_v35, %v5264_v19  ;;  %v2231_v34 = vpop.f32.mrf.mxu0 }
 0x19d   : > { %v1921_v0 = vpop.f32.mrf.mxu1  ;;  %v5364_v14 = vadd.f32 %v2231_v34, %v2046_v37 }
 0x19e   : > { %v2050_v44 = vadd.f32 %v1921_v0, %v5267_v8  ;;  %v4092_v41 = vpop.f32.mrf.mxu0 }
 0x19f   : > { %v4058_v49 = vpop.f32.mrf.mxu1  ;;  %v5367_v17 = vadd.f32 %v4092_v41, %v2051_v22 }
 0x1a0   : > { %v2055_v48 = vadd.f32 %v4058_v49, %v5271_v7  ;;  %v2244_v20 = vpop.f32.mrf.mxu0 }
 0x1a1   : > { %v1934_v16 = vpop.f32.mrf.mxu1  ;;  %v5370_v42 = vadd.f32 %v2244_v20, %v2049_v25 }
 0x1a2   : > { %v2053_v58 = vadd.f32 %v1934_v16, %v5274_v57  ;;  %v4093_v38 = vpop.f32.mrf.mxu0 }
 0x1a3   : > { %v4059_v19 = vpop.f32.mrf.mxu1  ;;  %v5373_v11 = vadd.f32 %v4093_v38, %v2052_v39 }
 0x1a4   : > { %v2056_v29 = vadd.f32 %v4059_v19, %v5277_v63  ;;  %v2247_v18 = vpop.f32.mrf.mxu0 }
 0x1a5   : > { %v1937_v8 = vpop.f32.mrf.mxu1  ;;  %v5376_v23 = vadd.f32 %v2247_v18, %v2050_v44 }
 0x1a6   : > { %v2054_v59 = vadd.f32 %v1937_v8, %v5280_v36  ;;  %v4096_v45 = vpop.f32.mrf.mxu0 }
 0x1a7   : > { %v4062_v7 = vpop.f32.mrf.mxu1  ;;  %v5379_v12 = vadd.f32 %v4096_v45, %v2055_v48 }
 0x1a8   : > { %v2059_v6 = vadd.f32 %v4062_v7, %v5283_v5  ;;  %v2260_v37 = vpop.f32.mrf.mxu0 }
 0x1a9   : > { %v1950_v57 = vpop.f32.mrf.mxu1  ;;  %v5382_v28 = vadd.f32 %v2260_v37, %v2053_v58 }
 0x1aa   : > { %v2057_v27 = vadd.f32 %v1950_v57, %v5286_v31  ;;  %v4097_v22 = vpop.f32.mrf.mxu0 }
 0x1ab   : > { %v4063_v63 = vpop.f32.mrf.mxu1  ;;  %v5385_v60 = vadd.f32 %v4097_v22, %v2056_v29 }
 0x1ac   : > { %v2060_v52 = vadd.f32 %v4063_v63, %v5289_v15  ;;  %v2263_v25 = vpop.f32.mrf.mxu0 }
 0x1ad   : > { %v1953_v36 = vpop.f32.mrf.mxu1  ;;  %v5388_v53 = vadd.f32 %v2263_v25, %v2054_v59 }
 0x1ae   : > { %v2058_v35 = vadd.f32 %v1953_v36, %v5292_v30  ;;  %v4100_v39 = vpop.f32.mrf.mxu0 }
 0x1af   : > { %v4066_v5 = vpop.f32.mrf.mxu1  ;;  %v5391_v34 = vadd.f32 %v4100_v39, %v2059_v6 }
 0x1b0   : > { %v2063_v0 = vadd.f32 %v4066_v5, %v5295_v21  ;;  %v2276_v44 = vpop.f32.mrf.mxu0 }
 0x1b1   : > { %v1966_v31 = vpop.f32.mrf.mxu1  ;;  %v5394_v41 = vadd.f32 %v2276_v44, %v2057_v27 }
 0x1b2   : > { %v2061_v49 = vadd.f32 %v1966_v31, %v5298_v32  ;;  %v4101_v48 = vpop.f32.mrf.mxu0 }
 0x1b3   : > { %v4067_v15 = vpop.f32.mrf.mxu1  ;;  %v5397_v20 = vadd.f32 %v4101_v48, %v2060_v52 }
 0x1b4   : > { %v2064_v16 = vadd.f32 %v4067_v15, %v5301_v10  ;;  %v2279_v58 = vpop.f32.mrf.mxu0 }
 0x1b5   : > { %v1969_v30 = vpop.f32.mrf.mxu1  ;;  %v5400_v38 = vadd.f32 %v2279_v58, %v2058_v35 }
 0x1b6   : > { %v2062_v19 = vadd.f32 %v1969_v30, %v5304_v1  ;;  %v4104_v29 = vpop.f32.mrf.mxu0 }
 0x1b7   : > { %v4070_v21 = vpop.f32.mrf.mxu1  ;;  %v5403_v18 = vadd.f32 %v4104_v29, %v2063_v0  ;;  %v5432_v29 = vpop.permute.xlu1 %3186 }
 0x1b8   : > { %v2067_v8 = vadd.f32 %v4070_v21, %v5307_v47  ;;  %v2292_v59 = vpop.f32.mrf.mxu0 }
 0x1b9   : > { %v1982_v32 = vpop.f32.mrf.mxu1  ;;  %v5406_v45 = vadd.f32 %v2292_v59, %v2061_v49 }
 0x1ba   : > { %v2065_v7 = vadd.f32 %v1982_v32, %v5310_v24  ;;  %v4105_v6 = vpop.f32.mrf.mxu0 }
 0x1bb   : > { %v4071_v10 = vpop.f32.mrf.mxu1  ;;  %v5409_v37 = vadd.f32 %v4105_v6, %v2064_v16 }
 0x1bc   : > { %v2068_v57 = vadd.f32 %v4071_v10, %v5313_v13  ;;  %v2295_v27 = vpop.f32.mrf.mxu0 }
 0x1bd   : > { %v1985_v1 = vpop.f32.mrf.mxu1  ;;  %v5412_v22 = vadd.f32 %v2295_v27, %v2062_v19 }
 0x1be   : > { %v2066_v63 = vadd.f32 %v1985_v1, %v5316_v50  ;;  %v4108_v52 = vpop.f32.mrf.mxu0 }
 0x1bf   : > { %v4074_v47 = vpop.f32.mrf.mxu1  ;;  %v5415_v25 = vadd.f32 %v4108_v52, %v2067_v8 }
 0x1c0   : > { %v2071_v36 = vadd.f32 %v4074_v47, %v5319_v40  ;;  %v2308_v35 = vpop.f32.mrf.mxu0  ;;  %v5427_v40 = vpop.permute.xlu0 %3176 }
 0x1c1   : > { %v1998_v24 = vpop.f32.mrf.mxu1  ;;  %v5418_v39 = vadd.f32 %v2308_v35, %v2065_v7 }
 0x1c2   : > { %v2069_v5 = vadd.f32 %v1998_v24, %v5322_v33  ;;  %v4109_v0 = vpop.f32.mrf.mxu0 }
 0x1c3   : > { %v4075_v13 = vpop.f32.mrf.mxu1  ;;  %v5421_v44 = vadd.f32 %v4109_v0, %v2068_v57 }
 0x1c4   : > { %v2072_v31 = vadd.f32 %v4075_v13, %v5325_v62  ;;  %v2311_v49 = vpop.f32.mrf.mxu0  ;;  %v5440_v10 = vpop.permute.xlu0 %3181 }
 0x1c5   : > { %v2001_v50 = vpop.f32.mrf.mxu1  ;;  %v5424_v48 = vadd.f32 %v2311_v49, %v2066_v63  ;;  %v5445_v63 = vpop.permute.xlu1 %3191 }
 0x1c6   : > { %v2070_v15 = vadd.f32 %v2001_v50, %v5328_v56  ;;  %v4112_v16 = vpop.f32.mrf.mxu0 }
 0x1c7   : > { %v4078_v58 = vpop.f32.mrf.mxu1  ;;  %v5429_v30 = vadd.f32 %v4112_v16, %v2071_v36 }
 0x1c8   : > { %v2075_v33 = vadd.f32 %v4078_v58, %v5331_v4  ;;  %v2324_v19 = vpop.f32.mrf.mxu0  ;;  %v5453_v0 = vpop.permute.xlu0 %3196 }
 0x1c9   : > { %v2014_v21 = vpop.f32.mrf.mxu1  ;;  %v5434_v8 = vadd.f32 %v2324_v19, %v2069_v5  ;;  %v5458_v50 = vpop.permute.xlu1 %3201 }
 0x1ca   : > { %v2073_v62 = vadd.f32 %v2014_v21, %v5334_v9  ;;  %v4113_v59 = vpop.f32.mrf.mxu0 }
 0x1cb   : > { %v4079_v32 = vpop.f32.mrf.mxu1  ;;  %v5437_v7 = vadd.f32 %v4113_v59, %v2072_v31 }
 0x1cc   : > { %v2076_v56 = vadd.f32 %v4079_v32, %v5337_v55  ;;  %v2327_v6 = vpop.f32.mrf.mxu0  ;;  %v5465_v21 = vpop.permute.xlu0 %3206 }
 0x1cd   : > { %v2017_v57 = vpop.f32.mrf.mxu1  ;;  %v5442_v27 = vadd.f32 %v2327_v6, %v2070_v15 }
 0x1ce   : > { %v2074_v4 = vadd.f32 %v2017_v57, %v5340_v3  ;;  %v4116_v1 = vpop.f32.mrf.mxu0 }
 0x1cf   : > { %v4082_v52 = vpop.f32.mrf.mxu1  ;;  %v5447_v47 = vadd.f32 %v4116_v1, %v2075_v33 }
 0x1d0   : > { %v2079_v9 = vadd.f32 %v4082_v52, %v5343_v26  ;;  %v2340_v36 = vpop.f32.mrf.mxu0  ;;  %v5475_v52 = vpop.permute.xlu0 %3216 }
 0x1d1   : > { %v2030_v35 = vpop.f32.mrf.mxu1  ;;  %v5450_v24 = vadd.f32 %v2340_v36, %v2073_v62 }
 0x1d2   : > { %v2077_v55 = vadd.f32 %v2030_v35, %v5346_v61  ;;  %v4117_v5 = vpop.f32.mrf.mxu0 }
 0x1d3   : > { %v4083_v13 = vpop.f32.mrf.mxu1  ;;  %v5455_v31 = vadd.f32 %v4117_v5, %v2076_v56 }
 0x1d4   : > { %v2080_v3 = vadd.f32 %v4083_v13, %v5349_v46  ;;  %v2343_v49 = vpop.f32.mrf.mxu0  ;;  %v5469_v46 = vpop.permute.xlu1 %3211 }
 0x1d5   : > { %v2033_v15 = vpop.f32.mrf.mxu1  ;;  %v5460_v16 = vadd.f32 %v2343_v49, %v2074_v4 }
 0x1d6   : > { %v2078_v26 = vadd.f32 %v2033_v15, %v5352_v54  ;;  %v4120_v58 = vpop.f32.mrf.mxu0 }
 0x1d7   : > { %5640 = vst [vmem:[#allocation5_spill] sm:$0xff] %v5460_v16  ;;  %v5463_v33 = vadd.f32 %v4120_v58, %v2079_v9  ;;  %v4126_v61 = vpop.f32.mrf.mxu1 }
 0x1d8   : > { %v2356_v19 = vpop.f32.mrf.mxu0  ;;  %v2699_v9 = vadd.f32 %v4126_v61, %v5355_v43  ;;  %v5479_v5 = vpop.permute.xlu1 %3221 }
 0x1d9   : > { %5641 = vst [vmem:[#allocation6_spill] sm:$0xff] %v5463_v33  ;;  %v5467_v62 = vadd.f32 %v2356_v19, %v2077_v55  ;;  %v2554_v59 = vpop.f32.mrf.mxu1 }
 0x1da   : > { %v4121_v32 = vpop.f32.mrf.mxu0  ;;  %v2697_v36 = vadd.f32 %v2554_v59, %v5358_v51 }
 0x1db   : > { %5642 = vst [vmem:[#allocation7_spill] sm:$0xff] %v5467_v62  ;;  %v5471_v56 = vadd.f32 %v4121_v32, %v2080_v3  ;;  %v4127_v6 = vpop.f32.mrf.mxu1  ;;  %v5489_v32 = vpop.permute.xlu0 %3226 }
 0x1dc   : > { %v2359_v57 = vpop.f32.mrf.mxu0  ;;  %v2700_v13 = vadd.f32 %v4127_v6, %v5361_v2 }
 0x1dd   : > { %5643 = vst [vmem:[#allocation8_spill] sm:$0xff] %v5471_v56  ;;  %v5473_v4 = vadd.f32 %v2359_v57, %v2078_v26  ;;  %v2557_v54 = vpop.f32.mrf.mxu1  ;;  %v5485_v26 = vld [vmem:[%s5635_s2] ss:$0 sm:$0xff] }
 0x1de   : > { %v4164_v1 = vpop.f32.mrf.mxu0  ;;  %v2698_v19 = vadd.f32 %v2557_v54, %v5364_v14 }
 0x1df   : > { %5644 = vst [vmem:[#allocation9_spill] sm:$0xff] %v5473_v4  ;;  %v4130_v35 = vpop.f32.mrf.mxu1  ;;  %v3025_v3 = vadd.f32 %v4164_v1, %v2699_v9  ;;  %v5492_v9 = vpop.permute.xlu1 %3231 }
 0x1e0   : > { %v2880_v55 = vpop.f32.mrf.mxu0  ;;  %v5499_v16 = vpop.permute.xlu0 %3236 }
 0x1e1   : > { %v2570_v49 = vpop.f32.mrf.mxu1  ;;  %v3023_v15 = vadd.f32 %v2880_v55, %v2697_v36  ;;  %v3068_v2 = vadd.f32 %v5485_v26, %v3025_v3 }
 0x1e2   : > { %v4165_v58 = vpop.f32.mrf.mxu0  ;;  %v2701_v36 = vadd.f32 %v2570_v49, %v5370_v42 }
 0x1e3   : > { %v3066_v43 = vadd.f32 %v5485_v26, %v3023_v15  ;;  %v4131_v51 = vpop.f32.mrf.mxu1  ;;  %v3026_v61 = vadd.f32 %v4165_v58, %v2700_v13  ;;  %v2703_v13 = vadd.f32 %v4130_v35, %v5367_v17  ;;  %v3104_v58 = vmax.f32 %v3068_v2, 0.0 }
 0x1e4   : > { %v2883_v59 = vpop.f32.mrf.mxu0 }
 0x1e5   : > { %v2573_v6 = vpop.f32.mrf.mxu1  ;;  %v3024_v57 = vadd.f32 %v2883_v59, %v2698_v19  ;;  %v3102_v55 = vmax.f32 %v3066_v43, 0.0  ;;  %v3069_v4 = vadd.f32 %v5485_v26, %v3026_v61  ;;  %v2704_v19 = vadd.f32 %v4131_v51, %v5373_v11 }
 0x1e6   : > { %v4168_v1 = vpop.f32.mrf.mxu0  ;;  %v2702_v17 = vadd.f32 %v2573_v6, %v5376_v23  ;;  %v3356_v11 = vmul.f32 %v5432_v29, %v3104_v58  ;;  %v5514_v58 = vpop.permute.xlu0 %3246 }
 0x1e7   : > { %v3067_v14 = vadd.f32 %v5485_v26, %v3024_v57  ;;  %v4134_v54 = vpop.f32.mrf.mxu1  ;;  %v3029_v59 = vadd.f32 %v4168_v1, %v2703_v13  ;;  %v3354_v42 = vmul.f32 %v5427_v40, %v3102_v55  ;;  %v3105_v49 = vmax.f32 %v3069_v4, 0.0 }
 0x1e8   : > { %v2896_v15 = vpop.f32.mrf.mxu0  ;;  %v2707_v23 = vadd.f32 %v4134_v54, %v5379_v12 }
 0x1e9   : > { %v3103_v56 = vmax.f32 %v3067_v14, 0.0  ;;  %v2586_v33 = vpop.f32.mrf.mxu1  ;;  %v3027_v3 = vadd.f32 %v2896_v15, %v2701_v36  ;;  %v5505_v14 = vpop.permute.xlu1 %3241  ;;  %v3072_v13 = vadd.f32 %v5485_v26, %v3029_v59 }
 0x1ea   : > { %v4169_v62 = vpop.f32.mrf.mxu0  ;;  %v2705_v55 = vadd.f32 %v2586_v33, %v5382_v28 }
 0x1eb   : > { %v3355_v43 = vmul.f32 %v5440_v10, %v3103_v56  ;;  %v3070_v61 = vadd.f32 %v5485_v26, %v3027_v3  ;;  %v4135_v57 = vpop.f32.mrf.mxu1  ;;  %v3030_v35 = vadd.f32 %v4169_v62, %v2704_v19  ;;  %v3357_v10 = vmul.f32 %v5445_v63, %v3105_v49 }
 0x1ec   : > { %v2899_v2 = vpop.f32.mrf.mxu0  ;;  %v2708_v63 = vadd.f32 %v4135_v57, %v5385_v60 }
 0x1ed   : > { %v3390_v51 = vadd.f32 %v3355_v43, %v3354_v42  ;;  %v3106_v1 = vmax.f32 %v3070_v61, 0.0  ;;  %v2589_v36 = vpop.f32.mrf.mxu1  ;;  %v3028_v40 = vadd.f32 %v2899_v2, %v2702_v17  ;;  %v3073_v62 = vadd.f32 %v5485_v26, %v3030_v35  ;;  %v5518_v61 = vpop.permute.xlu1 %3251 }
 0x1ee   : > { %v4172_v4 = vpop.f32.mrf.mxu0  ;;  %v3108_v43 = vmax.f32 %v3072_v13, 0.0  ;;  %v2706_v54 = vadd.f32 %v2589_v36, %v5388_v53 }
 0x1ef   : > { %v3391_v56 = vadd.f32 %v3390_v51, %v3356_v11  ;;  %v4138_v15 = vpop.f32.mrf.mxu1  ;;  %v3071_v6 = vadd.f32 %v5485_v26, %v3028_v40  ;;  %v3358_v3 = vmul.f32 %v5453_v0, %v3106_v1  ;;  %v3033_v28 = vadd.f32 %v4172_v4, %v2707_v23 }
 0x1f0   : > { %v2912_v29 = vpop.f32.mrf.mxu0  ;;  %v3109_v2 = vmax.f32 %v3073_v62, 0.0  ;;  %v3360_v60 = vmul.f32 %v5465_v21, %v3108_v43  ;;  %v2711_v53 = vadd.f32 %v4138_v15, %v5391_v34 }
 0x1f1   : > { %v3392_v19 = vadd.f32 %v3391_v56, %v3357_v10  ;;  %v2602_v59 = vpop.f32.mrf.mxu1  ;;  %v3031_v42 = vadd.f32 %v2912_v29, %v2705_v55  ;;  %v3107_v49 = vmax.f32 %v3071_v6, 0.0  ;;  %v3076_v40 = vadd.f32 %v5485_v26, %v3033_v28  ;;  %v5525_v56 = vpop.permute.xlu0 %3256 }
 0x1f2   : > { %v4173_v33 = vpop.f32.mrf.mxu0  ;;  %v2709_v36 = vadd.f32 %v2602_v59, %v5394_v41  ;;  %v3361_v23 = vmul.f32 %v5469_v46, %v3109_v2  ;;  %v5532_v29 = vpop.permute.xlu1 %3261 }
 0x1f3   : > { %v3393_v12 = vadd.f32 %v3392_v19, %v3358_v3  ;;  %v3074_v17 = vadd.f32 %v5485_v26, %v3031_v42  ;;  %v4139_v35 = vpop.f32.mrf.mxu1  ;;  %v3359_v0 = vmul.f32 %v5458_v50, %v3107_v49  ;;  %v3034_v11 = vadd.f32 %v4173_v33, %v2708_v63 }
 0x1f4   : > { %v2915_v51 = vpop.f32.mrf.mxu0  ;;  %v3112_v63 = vmax.f32 %v3076_v40, 0.0  ;;  %v2712_v41 = vadd.f32 %v4139_v35, %v5397_v20 }
 0x1f5   : > { %v2605_v1 = vpop.f32.mrf.mxu1  ;;  %v3032_v13 = vadd.f32 %v2915_v51, %v2706_v54  ;;  %v3394_v57 = vadd.f32 %v3393_v12, %v3359_v0  ;;  %v3110_v4 = vmax.f32 %v3074_v17, 0.0  ;;  %v3077_v6 = vadd.f32 %v5485_v26, %v3034_v11  ;;  %v5539_v0 = vpop.permute.xlu0 %3266 }
 0x1f6   : > { %v4176_v10 = vpop.f32.mrf.mxu0  ;;  %v2710_v49 = vadd.f32 %v2605_v1, %v5400_v38  ;;  %v3364_v20 = vmul.f32 %v5489_v32, %v3112_v63  ;;  %v5543_v1 = vpop.permute.xlu1 %3271 }
 0x1f7   : > { %v3075_v55 = vadd.f32 %v5485_v26, %v3032_v13  ;;  %v4142_v50 = vpop.f32.mrf.mxu1  ;;  %v3395_v62 = vadd.f32 %v3394_v57, %v3360_v60  ;;  %v3037_v19 = vadd.f32 %v4176_v10, %v2711_v53  ;;  %v3362_v34 = vmul.f32 %v5475_v52, %v3110_v4 }
 0x1f8   : > { %v2928_v21 = vpop.f32.mrf.mxu0  ;;  %v3113_v54 = vmax.f32 %v3077_v6, 0.0  ;;  %v2715_v10 = vadd.f32 %v4142_v50, %v5403_v18 }
 0x1f9   : > { %v3111_v3 = vmax.f32 %v3075_v55, 0.0  ;;  %v2618_v42 = vpop.f32.mrf.mxu1  ;;  %v3035_v43 = vadd.f32 %v2928_v21, %v2709_v36  ;;  %v3396_v15 = vadd.f32 %v3395_v62, %v3361_v23  ;;  %v3080_v11 = vadd.f32 %v5485_v26, %v3037_v19 }
 0x1fa   : > { %v4177_v59 = vpop.f32.mrf.mxu0  ;;  %v3365_v40 = vmul.f32 %v5492_v9, %v3113_v54 }
 0x1fb   : > { %v3363_v46 = vmul.f32 %v5479_v5, %v3111_v3  ;;  %v3078_v28 = vadd.f32 %v5485_v26, %v3035_v43  ;;  %v4143_v33 = vpop.f32.mrf.mxu1  ;;  %v3397_v12 = vadd.f32 %v3396_v15, %v3362_v34  ;;  %v3038_v17 = vadd.f32 %v4177_v59, %v2712_v41  ;;  %v3282_v59 = vpop.permute.xlu1 %3281 }
 0x1fc   : > { %v2931_v2 = vpop.f32.mrf.mxu0  ;;  %v2713_v5 = vadd.f32 %v2618_v42, %v5406_v45  ;;  %v3116_v55 = vmax.f32 %v3080_v11, 0.0  ;;  %v2716_v45 = vadd.f32 %v4143_v33, %v5409_v37  ;;  %v5552_v42 = vpop.permute.xlu0 %3276 }
 0x1fd   : > { %v2621_v52 = vpop.f32.mrf.mxu1  ;;  %v3036_v51 = vadd.f32 %v2931_v2, %v2710_v49  ;;  %v3398_v35 = vadd.f32 %v3397_v12, %v3363_v46  ;;  %v3114_v13 = vmax.f32 %v3078_v28, 0.0  ;;  %v3081_v53 = vadd.f32 %v5485_v26, %v3038_v17 }
 0x1fe   : > { %v4180_v38 = vpop.f32.mrf.mxu0  ;;  %v2714_v9 = vadd.f32 %v2621_v52, %v5412_v22  ;;  %v3368_v37 = vmul.f32 %v5514_v58, %v3116_v55 }
 0x1ff   : > { %v3079_v60 = vadd.f32 %v5485_v26, %v3036_v51  ;;  %v4146_v57 = vpop.f32.mrf.mxu1  ;;  %v3399_v4 = vadd.f32 %v3398_v35, %v3364_v20  ;;  %v3366_v6 = vmul.f32 %v5499_v16, %v3114_v13  ;;  %v3041_v3 = vadd.f32 %v4180_v38, %v2715_v10 }
 0x200   : > { %v2944_v36 = vpop.f32.mrf.mxu0  ;;  %v3117_v34 = vmax.f32 %v3081_v53, 0.0  ;;  %v2719_v22 = vadd.f32 %v4146_v57, %v5415_v25  ;;  %v3287_v20 = vpop.permute.xlu0 %3286 }
 0x201   : > { %v3115_v32 = vmax.f32 %v3079_v60, 0.0  ;;  %v2634_v23 = vpop.f32.mrf.mxu1  ;;  %v3039_v62 = vadd.f32 %v2944_v36, %v2713_v5  ;;  %v3400_v21 = vadd.f32 %v3399_v4, %v3365_v40  ;;  %v3084_v28 = vadd.f32 %v5485_v26, %v3041_v3  ;;  %v3292_v40 = vpop.permute.xlu1 %3291 }
 0x202   : > { %v4181_v19 = vpop.f32.mrf.mxu0  ;;  %v3369_v2 = vmul.f32 %v5518_v61, %v3117_v34 }
 0x203   : > { %v3367_v18 = vmul.f32 %v5505_v14, %v3115_v32  ;;  %v3082_v50 = vadd.f32 %v5485_v26, %v3039_v62  ;;  %v4147_v43 = vpop.f32.mrf.mxu1  ;;  %v3401_v63 = vadd.f32 %v3400_v21, %v3366_v6  ;;  %v3042_v15 = vadd.f32 %v4181_v19, %v2716_v45 }
 0x204   : > { %v2947_v41 = vpop.f32.mrf.mxu0  ;;  %v2717_v14 = vadd.f32 %v2634_v23, %v5418_v39  ;;  %v3120_v5 = vmax.f32 %v3084_v28, 0.0  ;;  %v2720_v39 = vadd.f32 %v4147_v43, %v5421_v44  ;;  %v3297_v19 = vpop.permute.xlu0 %3296 }
 0x205   : > { %v2637_v16 = vpop.f32.mrf.mxu1  ;;  %v3040_v49 = vadd.f32 %v2947_v41, %v2714_v9  ;;  %v3402_v46 = vadd.f32 %v3401_v63, %v3367_v18  ;;  %v3118_v33 = vmax.f32 %v3082_v50, 0.0  ;;  %v3085_v52 = vadd.f32 %v5485_v26, %v3042_v15  ;;  %v3302_v15 = vpop.permute.xlu1 %3301 }
 0x206   : > { %v4184_v12 = vpop.f32.mrf.mxu0  ;;  %v2718_v4 = vadd.f32 %v2637_v16, %v5424_v48  ;;  %v3372_v21 = vmul.f32 %v5539_v0, %v3120_v5 }
 0x207   : > { %v3083_v54 = vadd.f32 %v5485_v26, %v3040_v49  ;;  %v4150_v17 = vpop.f32.mrf.mxu1  ;;  %v3403_v11 = vadd.f32 %v3402_v46, %v3368_v37  ;;  %v3045_v35 = vadd.f32 %v4184_v12, %v2719_v22  ;;  %v3370_v60 = vmul.f32 %v5525_v56, %v3118_v33 }
 0x208   : > { %v2960_v51 = vpop.f32.mrf.mxu0  ;;  %v3121_v55 = vmax.f32 %v3085_v52, 0.0  ;;  %v2723_v43 = vadd.f32 %v4150_v17, %v5429_v30 }
 0x209   : > { %v3119_v58 = vmax.f32 %v3083_v54, 0.0  ;;  %v2650_v13 = vpop.f32.mrf.mxu1  ;;  %v3043_v38 = vadd.f32 %v2960_v51, %v2717_v14  ;;  %v3404_v25 = vadd.f32 %v3403_v11, %v3369_v2  ;;  %v3088_v62 = vadd.f32 %v5485_v26, %v3045_v35  ;;  %v3307_v11 = vpop.permute.xlu0 %3306 }
 0x20a   : > { %v4185_v57 = vpop.f32.mrf.mxu0  ;;  %v2721_v48 = vadd.f32 %v2650_v13, %v5434_v8  ;;  %v3373_v18 = vmul.f32 %v5543_v1, %v3121_v55 }
 0x20b   : > { %v3371_v61 = vmul.f32 %v5532_v29, %v3119_v58  ;;  %v3086_v10 = vadd.f32 %v5485_v26, %v3043_v38  ;;  %v4151_v53 = vpop.f32.mrf.mxu1  ;;  %v3405_v36 = vadd.f32 %v3404_v25, %v3370_v60  ;;  %v3046_v32 = vadd.f32 %v4185_v57, %v2720_v39  ;;  %v3312_v38 = vpop.permute.xlu1 %3311 }
 0x20c   : > { %v2963_v23 = vpop.f32.mrf.mxu0  ;;  %v3124_v41 = vmax.f32 %v3088_v62, 0.0  ;;  %v2724_v8 = vadd.f32 %v4151_v53, %v5437_v7 }
 0x20d   : > { %v2653_v6 = vpop.f32.mrf.mxu1  ;;  %v3044_v56 = vadd.f32 %v2963_v23, %v2718_v4  ;;  %v3406_v44 = vadd.f32 %v3405_v36, %v3371_v61  ;;  %v3122_v45 = vmax.f32 %v3086_v10, 0.0  ;;  %v3089_v63 = vadd.f32 %v5485_v26, %v3046_v32  ;;  %v3317_v62 = vpop.permute.xlu0 %3316 }
 0x20e   : > { %v4188_v3 = vpop.f32.mrf.mxu0  ;;  %v2722_v1 = vadd.f32 %v2653_v6, %v5442_v27  ;;  %v3376_v58 = vmul.f32 %v3287_v20, %v3124_v41 }
 0x20f   : > { %v3087_v29 = vadd.f32 %v5485_v26, %v3044_v56  ;;  %v4154_v9 = vpop.f32.mrf.mxu1  ;;  %v3407_v50 = vadd.f32 %v3406_v44, %v3372_v21  ;;  %v3374_v37 = vmul.f32 %v5552_v42, %v3122_v45  ;;  %v3049_v28 = vadd.f32 %v4188_v3, %v2723_v43 }
 0x210   : > { %v2976_v34 = vpop.f32.mrf.mxu0  ;;  %v3125_v54 = vmax.f32 %v3089_v63, 0.0  ;;  %v2727_v27 = vadd.f32 %v4154_v9, %v5447_v47  ;;  %v5646_v63 = vld [vmem:[#allocation7_spill] sm:$0xff] }
 0x211   : > { %v3123_v0 = vmax.f32 %v3087_v29, 0.0  ;;  %v2666_v16 = vpop.f32.mrf.mxu1  ;;  %v3047_v49 = vadd.f32 %v2976_v34, %v2721_v48  ;;  %v3408_v46 = vadd.f32 %v3407_v50, %v3373_v18  ;;  %v3092_v35 = vadd.f32 %v5485_v26, %v3049_v28  ;;  %v3322_v29 = vpop.permute.xlu1 %3321 }
 0x212   : > { %v4189_v33 = vpop.f32.mrf.mxu0  ;;  %v3377_v25 = vmul.f32 %v3292_v40, %v3125_v54  ;;  %v3327_v28 = vpop.permute.xlu0 %3326 }
 0x213   : > { %v3375_v12 = vmul.f32 %v3282_v59, %v3123_v0  ;;  %v3090_v30 = vadd.f32 %v5485_v26, %v3047_v49  ;;  %v4155_v22 = vpop.f32.mrf.mxu1  ;;  %v3409_v14 = vadd.f32 %v3408_v46, %v3374_v37  ;;  %v3050_v17 = vadd.f32 %v4189_v33, %v2724_v8 }
 0x214   : > { %v2979_v2 = vpop.f32.mrf.mxu0  ;;  %v2725_v59 = vadd.f32 %v2666_v16, %v5450_v24  ;;  %v3128_v36 = vmax.f32 %v3092_v35, 0.0  ;;  %v2728_v23 = vadd.f32 %v4155_v22, %v5455_v31  ;;  %v5645_v24 = vld [vmem:[#allocation5_spill] sm:$0xff]  ;;  %v5647_v16 = vld [vmem:[#allocation6_spill] sm:$0xff] }
 0x215   : > { %v2669_v52 = vpop.f32.mrf.mxu1  ;;  %v3048_v51 = vadd.f32 %v2979_v2, %v2722_v1  ;;  %v3410_v42 = vadd.f32 %v3409_v14, %v3375_v12  ;;  %v3126_v7 = vmax.f32 %v3090_v30, 0.0  ;;  %v3093_v57 = vadd.f32 %v5485_v26, %v3050_v17  ;;  %v5648_v14 = vld [vmem:[#allocation8_spill] sm:$0xff] }
 0x216   : > { %v4192_v13 = vpop.f32.mrf.mxu0  ;;  %v2726_v6 = vadd.f32 %v2669_v52, %v5645_v24  ;;  %v5649_v52 = vld [vmem:[#allocation9_spill] sm:$0xff] }
 0x217   : > { %v3091_v5 = vadd.f32 %v5485_v26, %v3048_v51  ;;  %v4158_v60 = vpop.f32.mrf.mxu1  ;;  %v3411_v39 = vadd.f32 %v3410_v42, %v3376_v58  ;;  %v3053_v20 = vadd.f32 %v4192_v13, %v2727_v27  ;;  %v3378_v55 = vmul.f32 %v3297_v19, %v3126_v7 }
 0x218   : > { %v2992_v4 = vpop.f32.mrf.mxu0  ;;  %v3129_v44 = vmax.f32 %v3093_v57, 0.0  ;;  %v3380_v19 = vmul.f32 %v3307_v11, %v3128_v36  ;;  %v2731_v49 = vadd.f32 %v4158_v60, %v5647_v16  ;;  %v3332_v11 = vpop.permute.xlu1 %3331 }
 0x219   : > { %v3127_v61 = vmax.f32 %v3091_v5, 0.0  ;;  %v2682_v10 = vpop.f32.mrf.mxu1  ;;  %v3051_v53 = vadd.f32 %v2992_v4, %v2725_v59  ;;  %v3412_v32 = vadd.f32 %v3411_v39, %v3377_v25  ;;  %v3096_v9 = vadd.f32 %v5485_v26, %v3053_v20  ;;  %v3337_v39 = vpop.permute.xlu0 %3336 }
 0x21a   : > { %v4193_v47 = vpop.f32.mrf.mxu0  ;;  %v2729_v34 = vadd.f32 %v2682_v10, %v5646_v63 }
 0x21b   : > { %v3379_v56 = vmul.f32 %v3302_v15, %v3127_v61  ;;  %v3094_v40 = vadd.f32 %v5485_v26, %v3051_v53  ;;  %v3413_v21 = vadd.f32 %v3412_v32, %v3378_v55  ;;  %v4159_v45 = vpop.f32.mrf.mxu1  ;;  %v3054_v3 = vadd.f32 %v4193_v47, %v2728_v23 }
 0x21c   : > { %v2995_v48 = vpop.f32.mrf.mxu0  ;;  %v3381_v15 = vmul.f32 %v3312_v38, %v3129_v44  ;;  %v3132_v33 = vmax.f32 %v3096_v9, 0.0  ;;  %v2732_v54 = vadd.f32 %v4159_v45, %v5648_v14  ;;  %v3342_v10 = vpop.permute.xlu1 %3341 }
 0x21d   : > { %v3052_v18 = vadd.f32 %v2995_v48, %v2726_v6  ;;  %v3414_v50 = vadd.f32 %v3413_v21, %v3379_v56  ;;  %v3130_v43 = vmax.f32 %v3094_v40, 0.0  ;;  %v3097_v37 = vadd.f32 %v5485_v26, %v3054_v3  ;;  %v2685_v46 = vpop.f32.mrf.mxu1  ;;  %v3347_v24 = vpop.permute.xlu0 %3346 }
 0x21e   : > { %v4196_v31 = vpop.f32.mrf.mxu0  ;;  %v2730_v51 = vadd.f32 %v2685_v46, %v5649_v52  ;;  %v3384_v59 = vmul.f32 %v3327_v28, %v3132_v33 }
 0x21f   : > { %v3095_v41 = vadd.f32 %v5485_v26, %v3052_v18  ;;  %v3415_v0 = vadd.f32 %v3414_v50, %v3380_v19  ;;  %v3382_v30 = vmul.f32 %v3317_v62, %v3130_v43  ;;  %v3057_v17 = vadd.f32 %v4196_v31, %v2731_v49 }
 0x220   : > { %v3008_v8 = vpop.f32.mrf.mxu0  ;;  %v3133_v7 = vmax.f32 %v3097_v37, 0.0  ;;  %v3352_v40 = vpop.permute.xlu1 %3351 }
 0x221   : > { %v3131_v1 = vmax.f32 %v3095_v41, 0.0  ;;  %v3055_v12 = vadd.f32 %v3008_v8, %v2729_v34  ;;  %v3416_v22 = vadd.f32 %v3415_v0, %v3381_v15  ;;  %v3100_v60 = vadd.f32 %v5485_v26, %v3057_v17 }
 0x222   : > { %v4197_v2 = vpop.f32.mrf.mxu0  ;;  %v3385_v4 = vmul.f32 %v3332_v11, %v3133_v7 }
 0x223   : > { %v3383_v58 = vmul.f32 %v3322_v29, %v3131_v1  ;;  %v3098_v42 = vadd.f32 %v5485_v26, %v3055_v12  ;;  %v3417_v35 = vadd.f32 %v3416_v22, %v3382_v30  ;;  %v3058_v13 = vadd.f32 %v4197_v2, %v2732_v54 }
 0x224   : > { %v3011_v38 = vpop.f32.mrf.mxu0  ;;  %v3136_v36 = vmax.f32 %v3100_v60, 0.0 }
 0x225   : > { %v3056_v27 = vadd.f32 %v3011_v38, %v2730_v51  ;;  %v3418_v5 = vadd.f32 %v3417_v35, %v3383_v58  ;;  %v3134_v25 = vmax.f32 %v3098_v42, 0.0  ;;  %v3101_v20 = vadd.f32 %v5485_v26, %v3058_v13 }
 0x226   : > { %v3388_v6 = vmul.f32 %v3347_v24, %v3136_v36 }
 0x227   : > { %v3099_v57 = vadd.f32 %v5485_v26, %v3056_v27  ;;  %v3419_v61 = vadd.f32 %v3418_v5, %v3384_v59  ;;  %v3386_v55 = vmul.f32 %v3337_v39, %v3134_v25  ;;  %v3137_v62 = vmax.f32 %v3101_v20, 0.0 }
 0x229   : > { %v3135_v53 = vmax.f32 %v3099_v57, 0.0  ;;  %v3420_v32 = vadd.f32 %v3419_v61, %v3385_v4  ;;  %v3389_v21 = vmul.f32 %v3352_v40, %v3137_v62 }
 0x22b   : > { %v3387_v23 = vmul.f32 %v3342_v10, %v3135_v53  ;;  %v3421_v47 = vadd.f32 %v3420_v32, %v3386_v55 }
 0x22d   : > { %v3422_v56 = vadd.f32 %v3421_v47, %v3387_v23 }
 0x22f   : > { %v3423_v44 = vadd.f32 %v3422_v56, %v3388_v6 }
 0x231   : > { %v3424_v45 = vadd.f32 %v3423_v44, %v3389_v21 }
 0x233   : > { %v3425_v3 = vrot.slane %v3424_v45, 4 }
 0x235   : > { %v3426_v48 = vadd.f32 %v3425_v3, %v3424_v45 }
 0x237   : > { %v3427_v26 = vrot.slane %v3426_v48, 2 }
 0x239   : > { %v3428_v29 = vadd.f32 %v3427_v26, %v3426_v48 }
 0x23b   : > { %v3429_v9 = vrot.slane %v3428_v29, 1 }
 0x23d   : > { %v3430_v18 = vadd.f32 %v3429_v9, %v3428_v29 }
 0x23f   : > { %v3431_v19 = vmul.f32 %v3430_v18, %v3430_v18 }
 0x241   : > { %3432 = vadd.xlane.f32.xlu0 %v3431_v19 }
 0x2ca   : > { %v3433_v50 = vpop.xlane.xlu0 %3432 }
 0x2cb   : > { %v3434_v43 = vmax.f32 %v3433_v50, 1e-24 }
 0x2cd   : > { %4253 = vrsqrt.f32 %v3434_v43 }
 0x2da   : > { %v4254_v31 = vpop.eup %4253 }
 0x2db   : > { %v3436_v63 = vmul.f32 %v4254_v31, %v3430_v18 }
 0x2dd   : > { %3437 = vst [vmem:[%s189_s28] sm:$0x1] %v3436_v63 }
 0x2de   : > { %4268 = shalt.err (!%p4265_p3)
}
 0x2df   : > { %s4269_s12 = scalar_lea.hbm %s3449_s6, 16  ;;  %s4273_s20 = scalar_lea.hbm %s5637_s4, 32 }
 0x2e0   : > { %p4270_p4 = scmp.ne.s32.totalorder %s3449_s6, %s4269_s12  ;;  %p4274_p9 = scmp.lt.s32.totalorder %s3449_s6, %s5637_s4 }
 0x2e1   : > { %p4275_p10 = scmp.lt.s32.totalorder %s4273_s20, %s4269_s12 }
 0x2e2   : > { %p4271_p7 = pnand %p4270_p4, %p4382_p5 }
 0x2e3   : > { %p4276_p11 = por %p4275_p10, %p4274_p9 }
 0x2e4   : > { %p4272_p8 = pneg %p4271_p7 }
 0x2e6   : > { %p4277_p12 = pnand %p4276_p11, %p4272_p8 }
 0x2e8   : > { %4280 = shalt.err (!%p4277_p12)
}
 0x2e9   : > { %4211 = dma.vmem_to_hbm [thread:$0]  (%p4382_p5), %s3452_s29, 16, %s3449_s6, %s3439_s7  }
 0x2ea PF: > { %p4217_p13 = scmp.ge.s32.totalorder %s4315_s18, 2  ;;  %s3463_s23 = sand.u32 1, %s4303_s15  }
 0x2eb   : > { %s3464_s27 = scalar_lea.sflag [#allocation3], %s3463_s23 }
 0x2ec   : > { %p4214_p0 = pnand %p4217_p13, %p4386_p6 }
 0x2ee   : > { %p4215_p1 = pneg %p4214_p0 }
 0x2f0   : > { %4298 = dma.done.wait (%p4215_p1), %s3464_s27, 16  }
 0x2f1   : > { %4300 = vsyncadd (%p4215_p1), %s3464_s27, 4294967280  ;;  %p14_p2 = scmp.ge.s32.totalorder %s4369_s21, 4   ;;  %s5650_s15 = smov %s4307_s16 }
 0x2f2   : > { %s5651_s16 = smov %s4311_s17  ;;  %s5652_s17 = smov %s4380_s24 }
 0x2f3   : > { %s5653_s18 = smov %s4369_s21  ;;  %16 = sbr.rel (!%p14_p2) target bundleno = 3 (0x3), region = 79 }
 0x2f8   :  { %3468 = vsyncpa [#allocation3], 1 }
 0x2f9   :  { %3470 = vsyncpa [#allocation3 + $0x1], 1 }

</bundles_post_ra>
